<compile_context>
chip_gen: v6e
topology: v6e:2x2x1
jax: 0.10.0
libtpu: 0.0.40
codegen_flags: <defaults>
</compile_context>

<pallas_src>
import functools

import jax
import jax.numpy as jnp
from jax import lax
from jax.experimental import pallas as pl
from jax.experimental.pallas import tpu as pltpu


def _lora_attention_kernel(x_ref, wqkv_ref, bqkv_ref, wproj_ref, bproj_ref,
                           y_ref, *, block_b, num_heads, head_dim):
    n = x_ref.shape[1]
    c = num_heads * head_dim
    m = block_b * n
    scale = head_dim ** -0.5

    # (block_b, N, C) -> (block_b*N, C): fill the MXU M dimension.
    x2d = x_ref[...].reshape(m, c)

    # ---- fused qkv projection: one big MXU matmul, f32 accumulation ----
    qkv = jnp.dot(x2d, wqkv_ref[...], preferred_element_type=jnp.float32)
    qkv = qkv + bqkv_ref[0]

    # ---- per-head attention (q_norm / k_norm = Identity, dropout = 0) ----
    acc = None
    for h in range(num_heads):                      # H is small; static unroll
        lo = h * head_dim
        # Column layout of qkv is [q | k | v], each (H, Dh) -> lane-aligned
        # 128-wide slices (head_dim = 128).
        q = qkv[:, lo:lo + head_dim].reshape(block_b, n, head_dim)
        k = qkv[:, c + lo:c + lo + head_dim].reshape(block_b, n, head_dim)
        v = qkv[:, 2 * c + lo:2 * c + lo + head_dim].reshape(block_b, n, head_dim)

        # Scores: contract the last dims directly (no k transpose / relayout),
        # batched over the block_b batch elements of this grid step.
        s = lax.dot_general(q, k, (((2,), (2,)), ((0,), (0,))),
                            preferred_element_type=jnp.float32)
        s = s * scale                                   # scale the (N, N) scores
        s = s - jnp.max(s, axis=-1, keepdims=True)      # stable softmax
        p = jnp.exp(s)
        p = p / jnp.sum(p, axis=-1, keepdims=True)      # exact denominator

        o = lax.dot_general(p, v, (((2,), (1,)), ((0,), (0,))),
                            preferred_element_type=jnp.float32)  # (Bt, N, Dh)

        # Per-head accumulation into the output projection: the lane-axis
        # concatenate becomes the matmul's K reduction for free.
        contrib = jnp.dot(o.reshape(m, head_dim),
                          wproj_ref[lo:lo + head_dim, :],
                          preferred_element_type=jnp.float32)
        acc = contrib if acc is None else acc + contrib

    y = acc + bproj_ref[0]
    y_ref[...] = y.reshape(block_b, n, c).astype(y_ref.dtype)


def _choose_block_batch(batch, n_tokens):
    """How many batch elements each grid step processes.

    Goal: block_b * N >= ~128 rows so the qkv / proj MXU matmuls are well
    filled, while keeping >= 2 grid steps when possible so both v7x
    TensorCores get work via the "parallel" grid axis.
    """
    divisors = [d for d in range(1, batch + 1) if batch % d == 0]
    fill = [d for d in divisors if d * n_tokens <= 128]
    block_b = max(fill) if fill else 1
    if batch // block_b < 2:
        for d in sorted(divisors, reverse=True):
            if batch // d >= 2 and (d * n_tokens >= 64 or d == 1):
                block_b = d
                break
    return block_b


def lora_attention_forward(x, params, *, num_heads, head_dim, block_b=None):
    B, N, C = x.shape
    assert C == num_heads * head_dim
    if block_b is None:
        block_b = _choose_block_batch(B, N)
    assert B % block_b == 0, "block_b must divide the batch"

    def const_spec(shape):
        # Weights / biases have a constant index_map -> Pallas keeps them
        # resident across grid steps (no re-DMA).
        return pl.BlockSpec(shape, lambda b: (0, 0))

    kernel = functools.partial(_lora_attention_kernel, block_b=block_b,
                               num_heads=num_heads, head_dim=head_dim)
    return pl.pallas_call(
        kernel,
        grid=(B // block_b,),
        in_specs=[
            pl.BlockSpec((block_b, N, C), lambda b: (b, 0, 0)),   # x
            const_spec((C, 3 * C)), const_spec((1, 3 * C)),       # qkv proj
            const_spec((C, C)), const_spec((1, C)),               # out proj
        ],
        out_specs=pl.BlockSpec((block_b, N, C), lambda b: (b, 0, 0)),
        out_shape=jax.ShapeDtypeStruct((B, N, C), x.dtype),
        compiler_params=pltpu.CompilerParams(
            dimension_semantics=("parallel",)),
    )(x, params["wqkv"], params["bqkv"], params["wproj"], params["bproj"])


def reference_forward(x, params, *, num_heads, head_dim):
    """Pure-JAX reference mirroring the PyTorch forward (eval mode)."""
    B, N, C = x.shape
    qkv = x @ params["wqkv"] + params["bqkv"][0]
    qkv = qkv.reshape(B, N, 3, num_heads, head_dim).transpose(2, 0, 3, 1, 4)
    q, k, v = qkv[0], qkv[1], qkv[2]
    scale = head_dim ** -0.5
    attn = (q @ jnp.swapaxes(k, -2, -1)) * scale
    attn = jax.nn.softmax(attn, axis=-1)
    o = attn @ v                                     # (B, H, N, Dh)
    o = jnp.swapaxes(o, 1, 2).reshape(B, N, C)
    return o @ params["wproj"] + params["bproj"][0]


def init_params(key, C, r):
    ks = jax.random.split(key, 16)
    n = lambda k, shape, s=0.02: (s * jax.random.normal(k, shape)).astype(jnp.float32)
    # The lora_* parameters exist in the module but the reference forward
    # never uses their result (dead code) -> they are not fed to the kernel.
    return {
        "wqkv": n(ks[0], (C, 3 * C)), "bqkv": n(ks[1], (1, 3 * C)),
        "wq_in": n(ks[2], (C, r)), "bq_in": n(ks[3], (1, r)),
        "wq_out": n(ks[4], (r, C)), "bq_out": n(ks[5], (1, C)),
        "wk_in": n(ks[6], (C, r)), "bk_in": n(ks[7], (1, r)),
        "wk_out": n(ks[8], (r, C)), "bk_out": n(ks[9], (1, C)),
        "wv_in": n(ks[10], (C, r)), "bv_in": n(ks[11], (1, r)),
        "wv_out": n(ks[12], (r, C)), "bv_out": n(ks[13], (1, C)),
        "wproj": n(ks[14], (C, C)), "bproj": n(ks[15], (1, C)),
    }


if __name__ == "__main__":
    # Small shapes consistent with the module: B=8 batch, N=16 tokens,
    # num_heads=2, head_dim=128 -> embed dim C=256, LoRA rank r=16.
    B, N, num_heads, head_dim, r = 8, 16, 2, 128, 16
    C = num_heads * head_dim

    key = jax.random.PRNGKey(0)
    kx, kp = jax.random.split(key)
    x = jax.random.normal(kx, (B, N, C), dtype=jnp.float32)
    params = init_params(kp, C, r)

    fwd = functools.partial(lora_attention_forward,
                            num_heads=num_heads, head_dim=head_dim)
    y = jax.block_until_ready(fwd(x, params))

    y_ref = reference_forward(x, params, num_heads=num_heads, head_dim=head_dim)
    assert y.shape == (B, N, C)
    # Normalized max-error check.  In interpret / f32-exact paths the error is
    # ~1e-6; the 1% bound also covers TPU default matmul precision (bf16-pass
    # MXU f32) differing between the Mosaic kernel and the XLA reference.
    err = float(jnp.max(jnp.abs(y - y_ref)))
    ref_scale = float(jnp.max(jnp.abs(y_ref)))
    assert err <= 1e-2 * ref_scale + 1e-5, f"mismatch vs JAX reference: {err}"

    print("KERNEL_OK")
</pallas_src>

<mosaic_0001>
module attributes {stable_mosaic.version = 11 : i64} {
  func.func @_lora_attention_kernel(%arg0: i32, %arg1: memref<4x16x256xf32, #tpu.memory_space<vmem>>, %arg2: memref<256x768xf32, #tpu.memory_space<vmem>>, %arg3: memref<1x768xf32, #tpu.memory_space<vmem>>, %arg4: memref<256x256xf32, #tpu.memory_space<vmem>>, %arg5: memref<1x256xf32, #tpu.memory_space<vmem>>, %arg6: memref<4x16x256xf32, #tpu.memory_space<vmem>>) attributes {dimension_semantics = [#tpu.dimension_semantics<parallel>], iteration_bounds = array<i64: 2>, scalar_prefetch = 0 : i64, scratch_operands = 0 : i64, tpu.core_type = #tpu.core_type<tc>, window_params = [{transform_indices = @transform_0, window_bounds = array<i64: 4, 16, 256>}, {pipeline_mode = #tpu.pipeline_mode<synchronous>, transform_indices = @transform_1, window_bounds = array<i64: 256, 768>}, {pipeline_mode = #tpu.pipeline_mode<synchronous>, transform_indices = @transform_2, window_bounds = array<i64: 1, 768>}, {pipeline_mode = #tpu.pipeline_mode<synchronous>, transform_indices = @transform_3, window_bounds = array<i64: 256, 256>}, {pipeline_mode = #tpu.pipeline_mode<synchronous>, transform_indices = @transform_4, window_bounds = array<i64: 1, 256>}, {transform_indices = @transform_5, window_bounds = array<i64: 4, 16, 256>}]} {
    %c0 = arith.constant 0 : index
    %c0_0 = arith.constant 0 : index
    %c0_1 = arith.constant 0 : index
    %0 = vector.load %arg1[%c0, %c0_0, %c0_1] : memref<4x16x256xf32, #tpu.memory_space<vmem>>, vector<4x16x256xf32>
    %1 = vector.shape_cast %0 : vector<4x16x256xf32> to vector<64x256xf32>
    %c0_2 = arith.constant 0 : index
    %c0_3 = arith.constant 0 : index
    %2 = vector.load %arg2[%c0_2, %c0_3] : memref<256x768xf32, #tpu.memory_space<vmem>>, vector<256x768xf32>
    %cst = arith.constant dense<0.000000e+00> : vector<64x768xf32>
    %3 = tpu.matmul %1, %2, %cst {dimension_numbers = #tpu.dot_dimension_numbers<[1], [0], [0], [1], [0, 0, 1, 1], [], []>} : vector<64x256xf32>, vector<256x768xf32>, vector<64x768xf32> -> vector<64x768xf32>
    %c0_4 = arith.constant 0 : index
    %c0_5 = arith.constant 0 : index
    %4 = vector.load %arg3[%c0_4, %c0_5] : memref<1x768xf32, #tpu.memory_space<vmem>>, vector<1x768xf32>
    %5 = vector.shape_cast %4 : vector<1x768xf32> to vector<768xf32>
    %6 = vector.shape_cast %5 : vector<768xf32> to vector<1x768xf32>
    %7 = vector.broadcast %6 : vector<1x768xf32> to vector<64x768xf32>
    %8 = arith.addf %3, %7 : vector<64x768xf32>
    %9 = vector.extract_strided_slice %8 {offsets = [0, 0], sizes = [64, 128], strides = [1, 1]} : vector<64x768xf32> to vector<64x128xf32>
    %10 = vector.shape_cast %9 : vector<64x128xf32> to vector<4x16x128xf32>
    %11 = vector.extract_strided_slice %8 {offsets = [0, 256], sizes = [64, 128], strides = [1, 1]} : vector<64x768xf32> to vector<64x128xf32>
    %12 = vector.shape_cast %11 : vector<64x128xf32> to vector<4x16x128xf32>
    %13 = vector.extract_strided_slice %8 {offsets = [0, 512], sizes = [64, 128], strides = [1, 1]} : vector<64x768xf32> to vector<64x128xf32>
    %14 = vector.shape_cast %13 : vector<64x128xf32> to vector<4x16x128xf32>
    %cst_6 = arith.constant dense<0.000000e+00> : vector<4x16x16xf32>
    %15 = tpu.matmul %10, %12, %cst_6 {dimension_numbers = #tpu.dot_dimension_numbers<[2], [2], [1], [1], [0, 0, 0, 1, 1, 1], [0], [0]>} : vector<4x16x128xf32>, vector<4x16x128xf32>, vector<4x16x16xf32> -> vector<4x16x16xf32>
    %cst_7 = arith.constant 0.0883883461 : f32
    %16 = vector.broadcast %cst_7 : f32 to vector<4x16x16xf32>
    %17 = arith.mulf %15, %16 : vector<4x16x16xf32>
    %cst_8 = arith.constant dense<0xFF800000> : vector<4x16xf32>
    %18 = vector.multi_reduction <maximumf>, %17, %cst_8 [2] : vector<4x16x16xf32> to vector<4x16xf32>
    %19 = vector.shape_cast %18 : vector<4x16xf32> to vector<4x16x1xf32>
    %20 = vector.broadcast %19 : vector<4x16x1xf32> to vector<4x16x16xf32>
    %21 = arith.subf %17, %20 : vector<4x16x16xf32>
    %22 = math.exp %21 : vector<4x16x16xf32>
    %cst_9 = arith.constant dense<0.000000e+00> : vector<4x16xf32>
    %23 = vector.multi_reduction <add>, %22, %cst_9 [2] : vector<4x16x16xf32> to vector<4x16xf32>
    %24 = vector.shape_cast %23 : vector<4x16xf32> to vector<4x16x1xf32>
    %25 = vector.broadcast %24 : vector<4x16x1xf32> to vector<4x16x16xf32>
    %26 = arith.divf %22, %25 : vector<4x16x16xf32>
    %cst_10 = arith.constant dense<0.000000e+00> : vector<4x16x128xf32>
    %27 = tpu.matmul %26, %14, %cst_10 {dimension_numbers = #tpu.dot_dimension_numbers<[2], [1], [1], [2], [0, 0, 0, 1, 1, 2], [0], [0]>} : vector<4x16x16xf32>, vector<4x16x128xf32>, vector<4x16x128xf32> -> vector<4x16x128xf32>
    %28 = vector.shape_cast %27 : vector<4x16x128xf32> to vector<64x128xf32>
    %c0_11 = arith.constant 0 : index
    %c0_12 = arith.constant 0 : index
    %29 = vector.load %arg4[%c0_11, %c0_12] : memref<256x256xf32, #tpu.memory_space<vmem>>, vector<128x256xf32>
    %cst_13 = arith.constant dense<0.000000e+00> : vector<64x256xf32>
    %30 = tpu.matmul %28, %29, %cst_13 {dimension_numbers = #tpu.dot_dimension_numbers<[1], [0], [0], [1], [0, 0, 1, 1], [], []>} : vector<64x128xf32>, vector<128x256xf32>, vector<64x256xf32> -> vector<64x256xf32>
    %31 = vector.extract_strided_slice %8 {offsets = [0, 128], sizes = [64, 128], strides = [1, 1]} : vector<64x768xf32> to vector<64x128xf32>
    %32 = vector.shape_cast %31 : vector<64x128xf32> to vector<4x16x128xf32>
    %33 = vector.extract_strided_slice %8 {offsets = [0, 384], sizes = [64, 128], strides = [1, 1]} : vector<64x768xf32> to vector<64x128xf32>
    %34 = vector.shape_cast %33 : vector<64x128xf32> to vector<4x16x128xf32>
    %35 = vector.extract_strided_slice %8 {offsets = [0, 640], sizes = [64, 128], strides = [1, 1]} : vector<64x768xf32> to vector<64x128xf32>
    %36 = vector.shape_cast %35 : vector<64x128xf32> to vector<4x16x128xf32>
    %cst_14 = arith.constant dense<0.000000e+00> : vector<4x16x16xf32>
    %37 = tpu.matmul %32, %34, %cst_14 {dimension_numbers = #tpu.dot_dimension_numbers<[2], [2], [1], [1], [0, 0, 0, 1, 1, 1], [0], [0]>} : vector<4x16x128xf32>, vector<4x16x128xf32>, vector<4x16x16xf32> -> vector<4x16x16xf32>
    %cst_15 = arith.constant 0.0883883461 : f32
    %38 = vector.broadcast %cst_15 : f32 to vector<4x16x16xf32>
    %39 = arith.mulf %37, %38 : vector<4x16x16xf32>
    %cst_16 = arith.constant dense<0xFF800000> : vector<4x16xf32>
    %40 = vector.multi_reduction <maximumf>, %39, %cst_16 [2] : vector<4x16x16xf32> to vector<4x16xf32>
    %41 = vector.shape_cast %40 : vector<4x16xf32> to vector<4x16x1xf32>
    %42 = vector.broadcast %41 : vector<4x16x1xf32> to vector<4x16x16xf32>
    %43 = arith.subf %39, %42 : vector<4x16x16xf32>
    %44 = math.exp %43 : vector<4x16x16xf32>
    %cst_17 = arith.constant dense<0.000000e+00> : vector<4x16xf32>
    %45 = vector.multi_reduction <add>, %44, %cst_17 [2] : vector<4x16x16xf32> to vector<4x16xf32>
    %46 = vector.shape_cast %45 : vector<4x16xf32> to vector<4x16x1xf32>
    %47 = vector.broadcast %46 : vector<4x16x1xf32> to vector<4x16x16xf32>
    %48 = arith.divf %44, %47 : vector<4x16x16xf32>
    %cst_18 = arith.constant dense<0.000000e+00> : vector<4x16x128xf32>
    %49 = tpu.matmul %48, %36, %cst_18 {dimension_numbers = #tpu.dot_dimension_numbers<[2], [1], [1], [2], [0, 0, 0, 1, 1, 2], [0], [0]>} : vector<4x16x16xf32>, vector<4x16x128xf32>, vector<4x16x128xf32> -> vector<4x16x128xf32>
    %50 = vector.shape_cast %49 : vector<4x16x128xf32> to vector<64x128xf32>
    %c128 = arith.constant 128 : index
    %c0_19 = arith.constant 0 : index
    %51 = vector.load %arg4[%c128, %c0_19] : memref<256x256xf32, #tpu.memory_space<vmem>>, vector<128x256xf32>
    %cst_20 = arith.constant dense<0.000000e+00> : vector<64x256xf32>
    %52 = tpu.matmul %50, %51, %cst_20 {dimension_numbers = #tpu.dot_dimension_numbers<[1], [0], [0], [1], [0, 0, 1, 1], [], []>} : vector<64x128xf32>, vector<128x256xf32>, vector<64x256xf32> -> vector<64x256xf32>
    %53 = arith.addf %30, %52 : vector<64x256xf32>
    %c0_21 = arith.constant 0 : index
    %c0_22 = arith.constant 0 : index
    %54 = vector.load %arg5[%c0_21, %c0_22] : memref<1x256xf32, #tpu.memory_space<vmem>>, vector<1x256xf32>
    %55 = vector.shape_cast %54 : vector<1x256xf32> to vector<256xf32>
    %56 = vector.shape_cast %55 : vector<256xf32> to vector<1x256xf32>
    %57 = vector.broadcast %56 : vector<1x256xf32> to vector<64x256xf32>
    %58 = arith.addf %53, %57 : vector<64x256xf32>
    %59 = vector.shape_cast %58 : vector<64x256xf32> to vector<4x16x256xf32>
    %c0_23 = arith.constant 0 : index
    %c0_24 = arith.constant 0 : index
    %c0_25 = arith.constant 0 : index
    %60 = vector.load %arg6[%c0_23, %c0_24, %c0_25] : memref<4x16x256xf32, #tpu.memory_space<vmem>>, vector<4x16x256xf32>
    tpu.vector_store %arg6[%c0_23, %c0_24, %c0_25], %59 {strides = array<i32>} : memref<4x16x256xf32, #tpu.memory_space<vmem>>, vector<4x16x256xf32>,
    return
  }
  func.func @transform_0(%arg0: i32) -> (i32, i32, i32) {
    %c0_i32 = arith.constant 0 : i32
    %c0_i32_0 = arith.constant 0 : i32
    %c0_i32_1 = arith.constant 0 : i32
    return %arg0, %c0_i32, %c0_i32_0 : i32, i32, i32
  }
  func.func @transform_1(%arg0: i32) -> (i32, i32) {
    %c0_i32 = arith.constant 0 : i32
    %c0_i32_0 = arith.constant 0 : i32
    %c0_i32_1 = arith.constant 0 : i32
    return %c0_i32, %c0_i32_0 : i32, i32
  }
  func.func @transform_2(%arg0: i32) -> (i32, i32) {
    %c0_i32 = arith.constant 0 : i32
    %c0_i32_0 = arith.constant 0 : i32
    %c0_i32_1 = arith.constant 0 : i32
    return %c0_i32, %c0_i32_0 : i32, i32
  }
  func.func @transform_3(%arg0: i32) -> (i32, i32) {
    %c0_i32 = arith.constant 0 : i32
    %c0_i32_0 = arith.constant 0 : i32
    %c0_i32_1 = arith.constant 0 : i32
    return %c0_i32, %c0_i32_0 : i32, i32
  }
  func.func @transform_4(%arg0: i32) -> (i32, i32) {
    %c0_i32 = arith.constant 0 : i32
    %c0_i32_0 = arith.constant 0 : i32
    %c0_i32_1 = arith.constant 0 : i32
    return %c0_i32, %c0_i32_0 : i32, i32
  }
  func.func @transform_5(%arg0: i32) -> (i32, i32, i32) {
    %c0_i32 = arith.constant 0 : i32
    %c0_i32_0 = arith.constant 0 : i32
    %c0_i32_1 = arith.constant 0 : i32
    return %arg0, %c0_i32, %c0_i32_0 : i32, i32, i32
  }
}

</mosaic_0001>

<bundles_post_ra>
// kernel: tpu_custom_call.1
= control target key start
LH: loop header
LB: loop body
LE: loop exit
PB: predicated region body
PF: predicated region fallthrough
CT: control target
= control target key end

     0   :  { %10 = vsyncpa [#allocation3], 0  ;;  %s3953_s0 = inlined_call_operand.hbm [shape: f32[8,16,256], index: 0, kind: input, shape index: {}]   ;;  %s3954_s1 = inlined_call_operand.hbm [shape: f32[256,768], index: 1, kind: input, shape index: {}]   ;;  %s3955_s2 = inlined_call_operand.hbm [shape: f32[1,768], index: 2, kind: input, shape index: {}]   ;;  %s3956_s3 = inlined_call_operand.hbm [shape: f32[256,256], index: 3, kind: input, shape index: {}]   ;;  %s3957_s4 = inlined_call_operand.vmem [shape: f32[1,256], index: 4, kind: input, shape index: {}]   ;;  %s3958_s5 = inlined_call_operand.hbm [shape: f32[8,16,256], index: 5, kind: output, shape index: {}]  }
   0x1   :  { %12 = vsyncpa [#allocation3 + $0x1], 0 }
   0x2   :  { %13 = vsyncpa [#allocation6], 0 }
   0x3   :  { %14 = vsyncpa [#allocation9], 0 }
   0x4   :  { %15 = vsyncpa [#allocation4], 0 }
   0x5   :  { %17 = vsyncpa [#allocation4 + $0x1], 0  ;;  %s3347_s18 = smov 0   ;;  %s3349_s19 = smov 0  }
   0x6   :  { %s3351_s20 = smov 0   ;;  %s3353_s21 = smov 0  }
   0x7 LB: > { %s3368_s22 = sadd.s32 4294967295, %s3303_s21   ;;  %s2759_s23 = sadd.s32 4294967294, %s3303_s21   ;;  %s3303_s21 = sphi %s3353_s21, %s3984_s21   ;;  %s3299_s20 = sphi %s3351_s20, %s3983_s20   ;;  %s3295_s19 = sphi %s3349_s19, %s3982_s19   ;;  %s3291_s18 = sphi %s3347_s18, %s3981_s18  }
   0x8   : > { %p43_p0 = scmp.ne.s32.totalorder %s3295_s19, %s3291_s18  ;;  %p3959_p1 = scmp.eq.s32.totalorder %s3368_s22, 0 }
   0x9   : > { %p157_p3 = scmp.eq.s32.totalorder %s2759_s23, 1  ;;  %p2760_p5 = scmp.ge.s32.totalorder %s3303_s21, 1 }
   0xa   : > { %p3377_p4 = por %p3959_p1, %p43_p0  ;;  %p164_p7 = scmp.lt.s32.totalorder %s3303_s21, 3 }
   0xb   : > { %p3382_p6 = por %p157_p3, %p43_p0  ;;  %s3305_s27 = smov [#allocation5]  }
   0xc   : > { %s3964_s24 = scalar_select %p3377_p4, 1, 0 }
   0xd   : > { %s3965_s25 = scalar_select %p3382_p6, 1, 0 }
   0xe   : > { %p3387_p8 = pnand %p2760_p5, %p164_p7  ;;  %s176_s28 = sshll.u32 %s3305_s27, 4  ;;  %s177_s28 = int_to_ptr.vmem [resolvable:$true] %s176_s28 }
   0xf   : > { %s3306_s30 = smov [#allocation7]   ;;  %s3307_s7 = smov [#allocation8]  }
  0x10   : > { %s3966_s26 = scalar_select %p3387_p8, 1, 0 }
  0x11   : > { %p2993_p9 = pneg %p3387_p8  ;;  %s190_s6 = sshll.u32 %s3306_s30, 4  ;;  %s191_s6 = int_to_ptr.vmem [resolvable:$true] %s190_s6 }
  0x12   : > { %s200_s8 = sshll.u32 %s3307_s7, 4  ;;  %s3136_s9 = scalar_lea.vmem %s177_s28, 24576  ;;  %s201_s8 = int_to_ptr.vmem [resolvable:$true] %s200_s8 }
  0x13   : > { %p3396_p11 = pnand %p2993_p9, %p3959_p1  ;;  %p3137_p13 = scmp.ne.s32.totalorder %s177_s28, %s3136_s9 }
  0x14   : > { %p3144_p5 = scmp.lt.s32.totalorder %s177_s28, %s177_s28  ;;  %p3145_p7 = scmp.lt.s32.totalorder %s3136_s9, %s3136_s9 }
  0x15   : > { %p3127_p12 = pneg %p3396_p11 }
  0x16   : > { %p3146_p9 = por %p3145_p7, %p3144_p5 }
  0x17   : > { %p3139_p0 = pnand %p3137_p13, %p3127_p12 }
  0x19   : > { %p3140_p3 = pneg %p3139_p0 }
  0x1b   : > { %p3147_p10 = pnand %p3146_p9, %p3140_p3 }
  0x1d   : > { %3150 = shalt.err (!%p3147_p10)
}
  0x1e   : > { %s3308_s10 = smov 768   ;;  %s3309_s11 = smov 48  }
  0x1f   : > { %2996 = dma.hbm_to_vmem [thread:$0]  (!%p3396_p11), %s3954_s1, 24576, %s177_s28, [#allocation6], %s3308_s10, %s3308_s10, %s3309_s11  }
  0x20   : > { %s3162_s14 = scalar_lea.vmem %s191_s6, 96  ;;  %p3170_p2 = scmp.lt.s32.totalorder %s191_s6, %s191_s6 }
  0x21   : > { %p3163_p1 = scmp.ne.s32.totalorder %s191_s6, %s3162_s14  ;;  %p3171_p6 = scmp.lt.s32.totalorder %s3162_s14, %s3162_s14 }
  0x23   : > { %p3165_p13 = pnand %p3163_p1, %p3127_p12  ;;  %p3172_p5 = por %p3171_p6, %p3170_p2 }
  0x25   : > { %p3166_p0 = pneg %p3165_p13 }
  0x27   : > { %p3173_p3 = pnand %p3172_p5, %p3166_p0 }
  0x29   : > { %3176 = shalt.err (!%p3173_p3)
}
  0x2a   : > { %2999 = dma.hbm_to_vmem [thread:$0]  (!%p3396_p11), %s3955_s2, 96, %s191_s6, [#allocation6]  }
  0x2b   : > { %s3188_s17 = scalar_lea.vmem %s201_s8, 8192  ;;  %p3196_p9 = scmp.lt.s32.totalorder %s201_s8, %s201_s8 }
  0x2c   : > { %p3189_p10 = scmp.ne.s32.totalorder %s201_s8, %s3188_s17  ;;  %p3197_p13 = scmp.lt.s32.totalorder %s3188_s17, %s3188_s17 }
  0x2e   : > { %p3191_p7 = pnand %p3189_p10, %p3127_p12  ;;  %p3198_p4 = por %p3197_p13, %p3196_p9 }
  0x30   : > { %p3192_p1 = pneg %p3191_p7 }
  0x32   : > { %p3199_p2 = pnand %p3198_p4, %p3192_p1 }
  0x34   : > { %3202 = shalt.err (!%p3199_p2)
}
  0x35   : > { %s3961_s23 = smov 256   ;;  %s3311_s27 = smov 16  }
  0x36   : > { %3002 = dma.hbm_to_vmem [thread:$0]  (!%p3396_p11), %s3956_s3, 8192, %s201_s8, [#allocation9], %s3961_s23, %s3961_s23, %s3311_s27  }
  0x37   : > { %s3430_s6 = sadd.s32 1, %s3303_s21   ;;  %s30_s9 = sadd.s32 1, %s3299_s20 }
  0x38   : > { %s27_s7 = ssub.s32 %s3303_s21, %s3430_s6  ;;  %p37_p6 = scmp.ne.s32.totalorder %s3299_s20, %s3295_s19 }
  0x39   : > { %p28_p4 = scmp.eq.s32.totalorder %s27_s7, 0  ;;  %p38_p12 = scmp.eq.s32.totalorder %s3303_s21, 0 }
  0x3a   : > { %p3014_p0 = scmp.lt.s32.totalorder %s3303_s21, 2  ;;  %p3968_p3 = scmp.eq.s32.totalorder %s3368_s22, 1 }
  0x3b   : > { %s3440_s10 = scalar_select %p28_p4, %s3299_s20, %s30_s9  }
  0x3c   : > { %p39_p5 = por %p38_p12, %p37_p6  ;;  %p3444_p10 = por %p3968_p3, %p37_p6 }
  0x3d   : > { %s217_s11 = sand.u32 1, %s3299_s20   ;;  %s2798_s12 = sshll.u32 %s3303_s21, 11 }
  0x3e   : > { %s3969_s29 = scalar_select %p3444_p10, 1, 0 }
  0x3f   : > { %s2765_s8 = sshll.u32 %s217_s11, 7  ;;  %s3453_s15 = scalar_lea.hbm %s3953_s0, %s2798_s12 }
  0x40   : > { %s221_s16 = scalar_lea.vmem [#allocation2], %s2765_s8  ;;  %p3455_p11 = pnand %p3014_p0, %p39_p5 }
  0x41   : > { %s229_s17 = sshll.u32 %s221_s16, 4  ;;  %s3461_s30 = scalar_lea.sflag [#allocation3], %s217_s11  ;;  %s3459_s17 = int_to_ptr.vmem [resolvable:$true] %s229_s17 }
  0x42   : > { %s3203_s7 = scalar_lea.hbm %s3453_s15, 2048  ;;  %p3205_p1 = pneg %p3455_p11 }
  0x43   : > { %p3204_p7 = scmp.ne.s32.totalorder %s3453_s15, %s3203_s7  ;;  %s3208_s8 = scalar_lea.hbm %s3953_s0, 4096 }
  0x44   : > { %p3209_p2 = scmp.lt.s32.totalorder %s3453_s15, %s3953_s0  ;;  %p3210_p4 = scmp.lt.s32.totalorder %s3208_s8, %s3203_s7 }
  0x45   : > { %p3206_p9 = pnand %p3205_p1, %p3204_p7 }
  0x46   : > { %p3211_p6 = por %p3210_p4, %p3209_p2 }
  0x47   : > { %p3207_p13 = pneg %p3206_p9 }
  0x49   : > { %p3212_p12 = pnand %p3211_p6, %p3207_p13 }
  0x4b   : > { %3215 = shalt.err (!%p3212_p12)
}
  0x4c   : > { %s3216_s11 = scalar_lea.vmem %s3459_s17, 2048  ;;  %s3312_s16 = smov [#allocation2]  }
  0x4d   : > { %p3217_p0 = scmp.ne.s32.totalorder %s3459_s17, %s3216_s11  ;;  %s3221_s23 = sshll.u32 %s3312_s16, 4  ;;  %s3222_s23 = int_to_ptr.vmem [resolvable:$false] %s3221_s23 }
  0x4e   : > { %s3223_s9 = scalar_lea.vmem %s3222_s23, 4096  ;;  %p3224_p7 = scmp.lt.s32.totalorder %s3459_s17, %s3222_s23 }
  0x4f   : > { %p3219_p5 = pnand %p3217_p0, %p3205_p1  ;;  %p3225_p9 = scmp.lt.s32.totalorder %s3223_s9, %s3216_s11 }
  0x51   : > { %p3220_p3 = pneg %p3219_p5  ;;  %p3226_p10 = por %p3225_p9, %p3224_p7 }
  0x53   : > { %p3227_p8 = pnand %p3226_p10, %p3220_p3 }
  0x55   : > { %3230 = shalt.err (!%p3227_p8)
}
  0x56   : > { %s3971_s7 = smov 256   ;;  %p3972_p1 = scmp.ne.s32.totalorder %s3966_s26, 0 }
  0x57   : > { %3006 = dma.hbm_to_vmem [thread:$0]  (!%p3455_p11), %s3453_s15, 2048, %s3459_s17, %s3461_s30, %s3971_s7, %s3971_s7, %s3311_s27  }
  0x58   : > { %241 = sbr.rel (%p3972_p1) target bundleno = 1860 (0x744), region = 40  ;;  %s3488_s12 = sand.u32 (!%p3972_p1), 1, %s3295_s19  }
  0x59   : > { %s2770_s23 = sshll.u32 (!%p3972_p1), %s3488_s12, 7  ;;  %s244_s8 = scalar_lea.sflag (!%p3972_p1), [#allocation3], %s3488_s12 }
  0x5a   : > { %s3494_s28 = scalar_lea.vmem (!%p3972_p1), [#allocation2], %s2770_s23  ;;  %p3973_p8 = scmp.ne.s32.totalorder (!%p3972_p1), %s3964_s24, 0 }
  0x5d   : > { %3274 = dma.done.wait (%p3973_p8), %s244_s8, 2048  }
  0x5e   : > { %3276 = vsyncadd (%p3973_p8), %s244_s8, 4294965248  ;;  %p3974_p10 = scmp.eq.s32.totalorder %s3368_s22, 0 }
  0x60   : > { %3278 = dma.done.wait (%p3974_p10), [#allocation6], 24672   ;;  %p3975_p11 = pmov %p3974_p10 }
  0x61   : > { %p3976_p13 = pmov %p3974_p10 }
  0x62   : > { %3280 = vsyncadd (%p3975_p11), [#allocation6], 4294942624 }
  0x63   : > { %3282 = dma.done.wait (%p3976_p13), [#allocation9], 8192   ;;  %p3977_p2 = pmov %p3974_p10 }
  0x64   : > { %v397_v0 = vld [vmem:[#allocation5 + $0x2e8] sm:$0xff]  ;;  %v396_v1 = vld [vmem:[#allocation5 + $0x2e0] sm:$0xff]  ;;  %v391_v2 = vld [vmem:[#allocation5 + $0x2b8] sm:$0xff]  ;;  %vm1175_vm0 = vcmask 130048   ;;  %s3870_s27 = scalar_lea.vmem [#allocation10], %s2770_s23  ;;  %s2800_s15 = sshll.u32 %s3368_s22, 11 }
  0x65   : > { %3284 = vsyncadd (%p3977_p2), [#allocation9], 4294959104  ;;  %641 = vmatprep.subr.mxu1 %v397_v0  ;;  %v390_v3 = vld [vmem:[#allocation5 + $0x2b0] sm:$0xff]  ;;  %v385_v4 = vld [vmem:[#allocation5 + $0x288] sm:$0xff]  ;;  %s2657_s17 = sshll.u32 %s3870_s27, 4  ;;  %s3905_s14 = scalar_lea.hbm %s3958_s5, %s2800_s15  ;;  %s3907_s17 = int_to_ptr.vmem [resolvable:$true] %s2657_s17 }
  0x66   : > { %642 = vmatpush1.msra.mxu1 %v396_v1  ;;  %v395_v5 = vld [vmem:[#allocation5 + $0x2d8] sm:$0xff]  ;;  %v384_v6 = vld [vmem:[#allocation5 + $0x280] sm:$0xff]  ;;  %v394_v7 = vld [vmem:[#allocation5 + $0x2d0] sm:$0xff]  ;;  %s2643_s22 = scalar_lea.sflag [#allocation4], %s3488_s12  ;;  %s3231_s11 = scalar_lea.vmem %s3907_s17, 2048 }
  0x67   : > { %643 = vmatprep.subr.mxu1 %v391_v2  ;;  %528 = vmatprep.subr.mxu0 %v395_v5  ;;  %v379_v8 = vld [vmem:[#allocation5 + $0x258] sm:$0xff]  ;;  %v389_v9 = vld [vmem:[#allocation5 + $0x2a8] sm:$0xff]  ;;  %v388_v10 = vld [vmem:[#allocation5 + $0x2a0] sm:$0xff]  ;;  %p3232_p4 = scmp.ne.s32.totalorder %s3907_s17, %s3231_s11  ;;  %p3978_p6 = scmp.ne.s32.totalorder %s3969_s29, 0 }
  0x68   : > { %644 = vmatpush1.msra.mxu1 %v390_v3  ;;  %529 = vmatpush1.msra.mxu0 %v394_v7  ;;  %v378_v11 = vld [vmem:[#allocation5 + $0x250] sm:$0xff]  ;;  %v383_v12 = vld [vmem:[#allocation5 + $0x278] sm:$0xff]  ;;  %v373_v13 = vld [vmem:[#allocation5 + $0x228] sm:$0xff]  ;;  %s3314_s16 = smov [#allocation10]  }
  0x69   : > { %645 = vmatprep.subr.mxu1 %v385_v4  ;;  %530 = vmatprep.subr.mxu0 %v389_v9  ;;  %v382_v14 = vld [vmem:[#allocation5 + $0x270] sm:$0xff]  ;;  %v377_v15 = vld [vmem:[#allocation5 + $0x248] sm:$0xff]  ;;  %v372_v16 = vld [vmem:[#allocation5 + $0x220] sm:$0xff]  ;;  %p3233_p12 = pnand %p3232_p4, %p3978_p6  ;;  %s3235_s9 = sshll.u32 %s3314_s16, 4  ;;  %s3236_s9 = int_to_ptr.vmem [resolvable:$false] %s3235_s9 }
  0x6a   : > { %646 = vmatpush1.msra.mxu1 %v384_v6  ;;  %531 = vmatpush1.msra.mxu0 %v388_v10  ;;  %v376_v17 = vld [vmem:[#allocation5 + $0x240] sm:$0xff]  ;;  %v367_v18 = vld [vmem:[#allocation5 + $0x1f8] sm:$0xff]  ;;  %v366_v20 = vld [vmem:[#allocation5 + $0x1f0] sm:$0xff]  ;;  %s3237_s7 = scalar_lea.vmem %s3236_s9, 4096  ;;  %p3238_p5 = scmp.lt.s32.totalorder %s3907_s17, %s3236_s9 }
  0x6b   : > { %647 = vmatprep.subr.mxu1 %v379_v8  ;;  %532 = vmatprep.subr.mxu0 %v383_v12  ;;  %v371_v19 = vld [vmem:[#allocation5 + $0x218] sm:$0xff]  ;;  %v370_v21 = vld [vmem:[#allocation5 + $0x210] sm:$0xff]  ;;  %v361_v22 = vld [vmem:[#allocation5 + $0x1c8] sm:$0xff]  ;;  %p3234_p0 = pneg %p3233_p12  ;;  %p3239_p3 = scmp.lt.s32.totalorder %s3237_s7, %s3231_s11 }
  0x6c   : > { %648 = vmatpush1.msra.mxu1 %v378_v11  ;;  %533 = vmatpush1.msra.mxu0 %v382_v14  ;;  %v365_v23 = vld [vmem:[#allocation5 + $0x1e8] sm:$0xff]  ;;  %v360_v24 = vld [vmem:[#allocation5 + $0x1c0] sm:$0xff]  ;;  %v355_v26 = vld [vmem:[#allocation5 + $0x198] sm:$0xff] }
  0x6d   : > { %649 = vmatprep.subr.mxu1 %v373_v13  ;;  %534 = vmatprep.subr.mxu0 %v377_v15  ;;  %v364_v25 = vld [vmem:[#allocation5 + $0x1e0] sm:$0xff]  ;;  %v359_v27 = vld [vmem:[#allocation5 + $0x1b8] sm:$0xff]  ;;  %v354_v28 = vld [vmem:[#allocation5 + $0x190] sm:$0xff]  ;;  %p3240_p7 = por %p3239_p3, %p3238_p5 }
  0x6e   : > { %650 = vmatpush1.msra.mxu1 %v372_v16  ;;  %535 = vmatpush1.msra.mxu0 %v376_v17  ;;  %v358_v29 = vld [vmem:[#allocation5 + $0x1b0] sm:$0xff]  ;;  %v349_v30 = vld [vmem:[#allocation5 + $0x168] sm:$0xff]  ;;  %v348_v32 = vld [vmem:[#allocation5 + $0x160] sm:$0xff] }
  0x6f   : > { %651 = vmatprep.subr.mxu1 %v367_v18  ;;  %536 = vmatprep.subr.mxu0 %v371_v19  ;;  %v353_v31 = vld [vmem:[#allocation5 + $0x188] sm:$0xff]  ;;  %v352_v33 = vld [vmem:[#allocation5 + $0x180] sm:$0xff]  ;;  %v343_v34 = vld [vmem:[#allocation5 + $0x138] sm:$0xff]  ;;  %p3241_p9 = pnand %p3240_p7, %p3234_p0 }
  0x70   : > { %652 = vmatpush1.msra.mxu1 %v366_v20  ;;  %537 = vmatpush1.msra.mxu0 %v370_v21  ;;  %v347_v35 = vld [vmem:[#allocation5 + $0x158] sm:$0xff]  ;;  %v342_v36 = vld [vmem:[#allocation5 + $0x130] sm:$0xff]  ;;  %v337_v38 = vld [vmem:[#allocation5 + $0x108] sm:$0xff] }
  0x71   : > { %653 = vmatprep.subr.mxu1 %v361_v22  ;;  %538 = vmatprep.subr.mxu0 %v365_v23  ;;  %v346_v37 = vld [vmem:[#allocation5 + $0x150] sm:$0xff]  ;;  %v341_v39 = vld [vmem:[#allocation5 + $0x128] sm:$0xff]  ;;  %v336_v40 = vld [vmem:[#allocation5 + $0x100] sm:$0xff] }
  0x72   : > { %654 = vmatpush1.msra.mxu1 %v360_v24  ;;  %539 = vmatpush1.msra.mxu0 %v364_v25  ;;  %v340_v41 = vld [vmem:[#allocation5 + $0x120] sm:$0xff]  ;;  %v331_v42 = vld [vmem:[#allocation5 + $0xd8] sm:$0xff]  ;;  %v330_v44 = vld [vmem:[#allocation5 + $0xd0] sm:$0xff] }
  0x73   : > { %655 = vmatprep.subr.mxu1 %v355_v26  ;;  %540 = vmatprep.subr.mxu0 %v359_v27  ;;  %v335_v43 = vld [vmem:[#allocation5 + $0xf8] sm:$0xff]  ;;  %v334_v45 = vld [vmem:[#allocation5 + $0xf0] sm:$0xff]  ;;  %v325_v46 = vld [vmem:[#allocation5 + $0xa8] sm:$0xff] }
  0x74   : > { %656 = vmatpush1.msra.mxu1 %v354_v28  ;;  %541 = vmatpush1.msra.mxu0 %v358_v29  ;;  %v329_v47 = vld [vmem:[#allocation5 + $0xc8] sm:$0xff]  ;;  %v324_v48 = vld [vmem:[#allocation5 + $0xa0] sm:$0xff]  ;;  %v319_v50 = vld [vmem:[#allocation5 + $0x78] sm:$0xff] }
  0x75   : > { %657 = vmatprep.subr.mxu1 %v349_v30  ;;  %542 = vmatprep.subr.mxu0 %v353_v31  ;;  %v328_v49 = vld [vmem:[#allocation5 + $0xc0] sm:$0xff]  ;;  %v323_v51 = vld [vmem:[#allocation5 + $0x98] sm:$0xff]  ;;  %v318_v52 = vld [vmem:[#allocation5 + $0x70] sm:$0xff] }
  0x76   : > { %658 = vmatpush1.msra.mxu1 %v348_v32  ;;  %543 = vmatpush1.msra.mxu0 %v352_v33  ;;  %v322_v53 = vld [vmem:[#allocation5 + $0x90] sm:$0xff]  ;;  %v313_v54 = vld [vmem:[#allocation5 + $0x48] sm:$0xff]  ;;  %v312_v56 = vld [vmem:[#allocation5 + $0x40] sm:$0xff] }
  0x77   : > { %659 = vmatprep.subr.mxu1 %v343_v34  ;;  %544 = vmatprep.subr.mxu0 %v347_v35  ;;  %v317_v55 = vld [vmem:[#allocation5 + $0x68] sm:$0xff]  ;;  %v316_v57 = vld [vmem:[#allocation5 + $0x60] sm:$0xff]  ;;  %v307_v58 = vld [vmem:[#allocation5 + $0x18] sm:$0xff] }
  0x78   : > { %660 = vmatpush1.msra.mxu1 %v342_v36  ;;  %545 = vmatpush1.msra.mxu0 %v346_v37  ;;  %v311_v59 = vld [vmem:[#allocation5 + $0x38] sm:$0xff]  ;;  %v306_v60 = vld [vmem:[#allocation5 + $0x10] sm:$0xff]  ;;  %v493_v62 = vld [vmem:[#allocation5 + $0x5e8] sm:$0xff] }
  0x79   : > { %661 = vmatprep.subr.mxu1 %v337_v38  ;;  %546 = vmatprep.subr.mxu0 %v341_v39  ;;  %v310_v61 = vld [vmem:[#allocation5 + $0x30] sm:$0xff]  ;;  %v305_v63 = vld [vmem:[#allocation5 + $0x8] sm:$0xff]  ;;  %v492_v0 = vld [vmem:[#allocation5 + $0x5e0] sm:$0xff] }
  0x7a   : > { %662 = vmatpush1.msra.mxu1 %v336_v40  ;;  %547 = vmatpush1.msra.mxu0 %v340_v41  ;;  %v304_v1 = vld [vmem:[#allocation5] sm:$0xff]  ;;  %v487_v2 = vld [vmem:[#allocation5 + $0x5b8] sm:$0xff]  ;;  %v486_v4 = vld [vmem:[#allocation5 + $0x5b0] sm:$0xff] }
  0x7b   : > { %663 = vmatprep.subr.mxu1 %v331_v42  ;;  %548 = vmatprep.subr.mxu0 %v335_v43  ;;  %v491_v3 = vld [vmem:[#allocation5 + $0x5d8] sm:$0xff]  ;;  %v490_v5 = vld [vmem:[#allocation5 + $0x5d0] sm:$0xff]  ;;  %v481_v6 = vld [vmem:[#allocation5 + $0x588] sm:$0xff] }
  0x7c   : > { %664 = vmatpush1.msra.mxu1 %v330_v44  ;;  %549 = vmatpush1.msra.mxu0 %v334_v45  ;;  %v485_v7 = vld [vmem:[#allocation5 + $0x5a8] sm:$0xff]  ;;  %v480_v8 = vld [vmem:[#allocation5 + $0x580] sm:$0xff]  ;;  %v475_v10 = vld [vmem:[#allocation5 + $0x558] sm:$0xff] }
  0x7d   : > { %665 = vmatprep.subr.mxu1 %v325_v46  ;;  %550 = vmatprep.subr.mxu0 %v329_v47  ;;  %v484_v9 = vld [vmem:[#allocation5 + $0x5a0] sm:$0xff]  ;;  %v479_v11 = vld [vmem:[#allocation5 + $0x578] sm:$0xff]  ;;  %v474_v12 = vld [vmem:[#allocation5 + $0x550] sm:$0xff] }
  0x7e   : > { %666 = vmatpush1.msra.mxu1 %v324_v48  ;;  %551 = vmatpush1.msra.mxu0 %v328_v49  ;;  %v478_v13 = vld [vmem:[#allocation5 + $0x570] sm:$0xff]  ;;  %v469_v14 = vld [vmem:[#allocation5 + $0x528] sm:$0xff]  ;;  %v468_v16 = vld [vmem:[#allocation5 + $0x520] sm:$0xff] }
  0x7f   : > { %667 = vmatprep.subr.mxu1 %v319_v50  ;;  %552 = vmatprep.subr.mxu0 %v323_v51  ;;  %v473_v15 = vld [vmem:[#allocation5 + $0x548] sm:$0xff]  ;;  %v472_v17 = vld [vmem:[#allocation5 + $0x540] sm:$0xff]  ;;  %v463_v18 = vld [vmem:[#allocation5 + $0x4f8] sm:$0xff] }
  0x80   : > { %668 = vmatpush1.msra.mxu1 %v318_v52  ;;  %553 = vmatpush1.msra.mxu0 %v322_v53  ;;  %v467_v19 = vld [vmem:[#allocation5 + $0x518] sm:$0xff]  ;;  %v462_v20 = vld [vmem:[#allocation5 + $0x4f0] sm:$0xff]  ;;  %v457_v22 = vld [vmem:[#allocation5 + $0x4c8] sm:$0xff] }
  0x81   : > { %669 = vmatprep.subr.mxu1 %v313_v54  ;;  %554 = vmatprep.subr.mxu0 %v317_v55  ;;  %v466_v21 = vld [vmem:[#allocation5 + $0x510] sm:$0xff]  ;;  %v461_v23 = vld [vmem:[#allocation5 + $0x4e8] sm:$0xff]  ;;  %v456_v24 = vld [vmem:[#allocation5 + $0x4c0] sm:$0xff] }
  0x82   : > { %670 = vmatpush1.msra.mxu1 %v312_v56  ;;  %555 = vmatpush1.msra.mxu0 %v316_v57  ;;  %v460_v25 = vld [vmem:[#allocation5 + $0x4e0] sm:$0xff]  ;;  %v451_v26 = vld [vmem:[#allocation5 + $0x498] sm:$0xff]  ;;  %v450_v28 = vld [vmem:[#allocation5 + $0x490] sm:$0xff] }
  0x83   : > { %671 = vmatprep.subr.mxu1 %v307_v58  ;;  %556 = vmatprep.subr.mxu0 %v311_v59  ;;  %v455_v27 = vld [vmem:[#allocation5 + $0x4b8] sm:$0xff]  ;;  %v454_v29 = vld [vmem:[#allocation5 + $0x4b0] sm:$0xff]  ;;  %v445_v30 = vld [vmem:[#allocation5 + $0x468] sm:$0xff] }
  0x84   : > { %672 = vmatpush1.msra.mxu1 %v306_v60  ;;  %557 = vmatpush1.msra.mxu0 %v310_v61  ;;  %v449_v31 = vld [vmem:[#allocation5 + $0x488] sm:$0xff]  ;;  %v444_v32 = vld [vmem:[#allocation5 + $0x460] sm:$0xff]  ;;  %v439_v34 = vld [vmem:[#allocation5 + $0x438] sm:$0xff] }
  0x85   : > { %673 = vmatprep.subr.mxu1 %v493_v62  ;;  %558 = vmatprep.subr.mxu0 %v305_v63  ;;  %v448_v33 = vld [vmem:[#allocation5 + $0x480] sm:$0xff]  ;;  %v443_v35 = vld [vmem:[#allocation5 + $0x458] sm:$0xff]  ;;  %v438_v36 = vld [vmem:[#allocation5 + $0x430] sm:$0xff] }
  0x86   : > { %674 = vmatpush2.msra.mxu1 %v492_v0  ;;  %559 = vmatpush1.msra.mxu0 %v304_v1  ;;  %v442_v37 = vld [vmem:[#allocation5 + $0x450] sm:$0xff]  ;;  %v433_v38 = vld [vmem:[#allocation5 + $0x408] sm:$0xff]  ;;  %v432_v40 = vld [vmem:[#allocation5 + $0x400] sm:$0xff] }
  0x87   : > { %675 = vmatprep.subr.mxu1 %v487_v2  ;;  %560 = vmatprep.subr.mxu0 %v491_v3  ;;  %v437_v39 = vld [vmem:[#allocation5 + $0x428] sm:$0xff]  ;;  %v436_v41 = vld [vmem:[#allocation5 + $0x420] sm:$0xff]  ;;  %v427_v42 = vld [vmem:[#allocation5 + $0x3d8] sm:$0xff] }
  0x88   : > { %676 = vmatpush2.msra.mxu1 %v486_v4  ;;  %561 = vmatpush2.msra.mxu0 %v490_v5  ;;  %v431_v43 = vld [vmem:[#allocation5 + $0x3f8] sm:$0xff]  ;;  %v426_v44 = vld [vmem:[#allocation5 + $0x3d0] sm:$0xff]  ;;  %v421_v46 = vld [vmem:[#allocation5 + $0x3a8] sm:$0xff] }
  0x89   : > { %677 = vmatprep.subr.mxu1 %v481_v6  ;;  %562 = vmatprep.subr.mxu0 %v485_v7  ;;  %v430_v45 = vld [vmem:[#allocation5 + $0x3f0] sm:$0xff]  ;;  %v425_v47 = vld [vmem:[#allocation5 + $0x3c8] sm:$0xff]  ;;  %v420_v48 = vld [vmem:[#allocation5 + $0x3a0] sm:$0xff] }
  0x8a   : > { %678 = vmatpush2.msra.mxu1 %v480_v8  ;;  %563 = vmatpush2.msra.mxu0 %v484_v9  ;;  %v424_v49 = vld [vmem:[#allocation5 + $0x3c0] sm:$0xff]  ;;  %v415_v50 = vld [vmem:[#allocation5 + $0x378] sm:$0xff]  ;;  %v3509_v51 = vld [vmem:[%s3494_s28 + $0x8] sm:$0xff] }
  0x8b   : > { %679 = vmatprep.subr.mxu1 %v475_v10  ;;  %564 = vmatprep.subr.mxu0 %v479_v11  ;;  %v414_v52 = vld [vmem:[#allocation5 + $0x370] sm:$0xff]  ;;  %v419_v53 = vld [vmem:[#allocation5 + $0x398] sm:$0xff]  ;;  %v409_v54 = vld [vmem:[#allocation5 + $0x348] sm:$0xff] }
  0x8c   : > { %680 = vmatpush2.msra.mxu1 %v474_v12  ;;  %565 = vmatpush2.msra.mxu0 %v478_v13  ;;  %v418_v55 = vld [vmem:[#allocation5 + $0x390] sm:$0xff]  ;;  %v408_v56 = vld [vmem:[#allocation5 + $0x340] sm:$0xff]  ;;  %v413_v57 = vld [vmem:[#allocation5 + $0x368] sm:$0xff] }
  0x8d   : > { %681 = vmatprep.subr.mxu1 %v469_v14  ;;  %566 = vmatprep.subr.mxu0 %v473_v15  ;;  %v403_v58 = vld [vmem:[#allocation5 + $0x318] sm:$0xff]  ;;  %v412_v59 = vld [vmem:[#allocation5 + $0x360] sm:$0xff]  ;;  %v402_v60 = vld [vmem:[#allocation5 + $0x310] sm:$0xff] }
  0x8e   : > { %682 = vmatpush2.msra.mxu1 %v468_v16  ;;  %567 = vmatpush2.msra.mxu0 %v472_v17  ;;  %v407_v61 = vld [vmem:[#allocation5 + $0x338] sm:$0xff]  ;;  %v3513_v62 = vld [vmem:[%s3494_s28] sm:$0xff]  ;;  %v406_v63 = vld [vmem:[#allocation5 + $0x330] sm:$0xff] }
  0x8f   : > { %683 = vmatprep.subr.mxu1 %v463_v18  ;;  %568 = vmatprep.subr.mxu0 %v467_v19  ;;  %v3516_v0 = vld [vmem:[%s3494_s28 + $0x18] sm:$0xff]  ;;  %v401_v1 = vld [vmem:[#allocation5 + $0x308] sm:$0xff]  ;;  %v400_v2 = vld [vmem:[#allocation5 + $0x300] sm:$0xff] }
  0x90   : > { %684 = vmatpush2.msra.mxu1 %v462_v20  ;;  %569 = vmatpush2.msra.mxu0 %v466_v21  ;;  %v399_v3 = vld [vmem:[#allocation5 + $0x2f8] sm:$0xff]  ;;  %v3521_v4 = vld [vmem:[%s3494_s28 + $0x10] sm:$0xff]  ;;  %v3525_v5 = vld [vmem:[%s3494_s28 + $0x28] sm:$0xff] }
  0x91   : > { %685 = vmatprep.subr.mxu1 %v457_v22  ;;  %570 = vmatprep.subr.mxu0 %v461_v23  ;;  %v398_v6 = vld [vmem:[#allocation5 + $0x2f0] sm:$0xff]  ;;  %v393_v7 = vld [vmem:[#allocation5 + $0x2c8] sm:$0xff]  ;;  %v3532_v8 = vld [vmem:[%s3494_s28 + $0x20] sm:$0xff] }
  0x92   : > { %686 = vmatpush2.msra.mxu1 %v456_v24  ;;  %571 = vmatpush2.msra.mxu0 %v460_v25  ;;  %v3535_v9 = vld [vmem:[%s3494_s28 + $0x38] sm:$0xff]  ;;  %v392_v10 = vld [vmem:[#allocation5 + $0x2c0] sm:$0xff]  ;;  %v3542_v12 = vld [vmem:[%s3494_s28 + $0x30] sm:$0xff] }
  0x93   : > { %687 = vmatprep.subr.mxu1 %v451_v26  ;;  %572 = vmatprep.subr.mxu0 %v455_v27  ;;  %v387_v11 = vld [vmem:[#allocation5 + $0x298] sm:$0xff]  ;;  %v3545_v13 = vld [vmem:[%s3494_s28 + $0x48] sm:$0xff]  ;;  %v386_v14 = vld [vmem:[#allocation5 + $0x290] sm:$0xff] }
  0x94   : > { %688 = vmatpush2.msra.mxu1 %v450_v28  ;;  %573 = vmatpush2.msra.mxu0 %v454_v29  ;;  %v381_v15 = vld [vmem:[#allocation5 + $0x268] sm:$0xff]  ;;  %v3552_v16 = vld [vmem:[%s3494_s28 + $0x40] sm:$0xff]  ;;  %v3555_v17 = vld [vmem:[%s3494_s28 + $0x58] sm:$0xff] }
  0x95   : > { %689 = vmatprep.subr.mxu1 %v445_v30  ;;  %574 = vmatprep.subr.mxu0 %v449_v31  ;;  %v380_v18 = vld [vmem:[#allocation5 + $0x260] sm:$0xff]  ;;  %v375_v19 = vld [vmem:[#allocation5 + $0x238] sm:$0xff]  ;;  %v3562_v20 = vld [vmem:[%s3494_s28 + $0x50] sm:$0xff] }
  0x96   : > { %690 = vmatpush2.msra.mxu1 %v444_v32  ;;  %575 = vmatpush2.msra.mxu0 %v448_v33  ;;  %v3565_v21 = vld [vmem:[%s3494_s28 + $0x68] sm:$0xff]  ;;  %v374_v22 = vld [vmem:[#allocation5 + $0x230] sm:$0xff]  ;;  %v3572_v24 = vld [vmem:[%s3494_s28 + $0x60] sm:$0xff] }
  0x97   : > { %691 = vmatprep.subr.mxu1 %v439_v34  ;;  %576 = vmatprep.subr.mxu0 %v443_v35  ;;  %v369_v23 = vld [vmem:[#allocation5 + $0x208] sm:$0xff]  ;;  %v3575_v25 = vld [vmem:[%s3494_s28 + $0x78] sm:$0xff]  ;;  %v368_v26 = vld [vmem:[#allocation5 + $0x200] sm:$0xff] }
  0x98   : > { %692 = vmatpush2.msra.mxu1 %v438_v36  ;;  %577 = vmatpush2.msra.mxu0 %v442_v37  ;;  %v363_v27 = vld [vmem:[#allocation5 + $0x1d8] sm:$0xff]  ;;  %v3582_v28 = vld [vmem:[%s3494_s28 + $0x70] sm:$0xff]  ;;  %v357_v30 = vld [vmem:[#allocation5 + $0x1a8] sm:$0xff] }
  0x99   : > { %693 = vmatprep.subr.mxu1 %v433_v38  ;;  %578 = vmatprep.subr.mxu0 %v437_v39  ;;  %v362_v29 = vld [vmem:[#allocation5 + $0x1d0] sm:$0xff]  ;;  %v356_v31 = vld [vmem:[#allocation5 + $0x1a0] sm:$0xff]  ;;  %v351_v32 = vld [vmem:[#allocation5 + $0x178] sm:$0xff] }
  0x9a   : > { %694 = vmatpush2.msra.mxu1 %v432_v40  ;;  %579 = vmatpush2.msra.mxu0 %v436_v41  ;;  %v350_v33 = vld [vmem:[#allocation5 + $0x170] sm:$0xff]  ;;  %v345_v34 = vld [vmem:[#allocation5 + $0x148] sm:$0xff]  ;;  %v344_v35 = vld [vmem:[#allocation5 + $0x140] sm:$0xff] }
  0x9b   : > { %695 = vmatprep.subr.mxu1 %v427_v42  ;;  %580 = vmatprep.subr.mxu0 %v431_v43  ;;  %v339_v36 = vld [vmem:[#allocation5 + $0x118] sm:$0xff]  ;;  %v338_v37 = vld [vmem:[#allocation5 + $0x110] sm:$0xff]  ;;  %v333_v38 = vld [vmem:[#allocation5 + $0xe8] sm:$0xff] }
  0x9c   : > { %696 = vmatpush2.msra.mxu1 %v426_v44  ;;  %581 = vmatpush2.msra.mxu0 %v430_v45  ;;  %v332_v39 = vld [vmem:[#allocation5 + $0xe0] sm:$0xff]  ;;  %v327_v40 = vld [vmem:[#allocation5 + $0xb8] sm:$0xff]  ;;  %v326_v41 = vld [vmem:[#allocation5 + $0xb0] sm:$0xff] }
  0x9d   : > { %697 = vmatprep.subr.mxu1 %v421_v46  ;;  %582 = vmatprep.subr.mxu0 %v425_v47  ;;  %v321_v42 = vld [vmem:[#allocation5 + $0x88] sm:$0xff]  ;;  %v320_v43 = vld [vmem:[#allocation5 + $0x80] sm:$0xff]  ;;  %v315_v44 = vld [vmem:[#allocation5 + $0x58] sm:$0xff] }
  0x9e   : > { %698 = vmatpush2.msra.mxu1 %v420_v48  ;;  %583 = vmatpush2.msra.mxu0 %v424_v49  ;;  %v314_v45 = vld [vmem:[#allocation5 + $0x50] sm:$0xff]  ;;  %v309_v46 = vld [vmem:[#allocation5 + $0x28] sm:$0xff]  ;;  %v308_v47 = vld [vmem:[#allocation5 + $0x20] sm:$0xff] }
  0x9f   : > { %699 = vmatprep.subr.mxu1 %v415_v50  ;;  %705 = vmatprep.mubr.f32.mxu1 %v3509_v51  ;;  %v495_v48 = vld [vmem:[#allocation5 + $0x5f8] sm:$0xff]  ;;  %v494_v49 = vld [vmem:[#allocation5 + $0x5f0] sm:$0xff]  ;;  %v489_v50 = vld [vmem:[#allocation5 + $0x5c8] sm:$0xff] }
  0xa0   : > { %700 = vmatpush2.msra.mxu1 %v414_v52  ;;  %584 = vmatprep.subr.mxu0 %v419_v53  ;;  %v483_v52 = vld [vmem:[#allocation5 + $0x598] sm:$0xff]  ;;  %v482_v53 = vld [vmem:[#allocation5 + $0x590] sm:$0xff] }
  0xa1   : > { %701 = vmatprep.subr.mxu1 %v409_v54  ;;  %585 = vmatpush2.msra.mxu0 %v418_v55  ;;  %v477_v54 = vld [vmem:[#allocation5 + $0x568] sm:$0xff]  ;;  %v476_v55 = vld [vmem:[#allocation5 + $0x560] sm:$0xff] }
  0xa2   : > { %702 = vmatpush2.msra.mxu1 %v408_v56  ;;  %586 = vmatprep.subr.mxu0 %v413_v57  ;;  %v471_v56 = vld [vmem:[#allocation5 + $0x538] sm:$0xff]  ;;  %v470_v57 = vld [vmem:[#allocation5 + $0x530] sm:$0xff] }
  0xa3   : > { %703 = vmatprep.subr.mxu1 %v403_v58  ;;  %587 = vmatpush2.msra.mxu0 %v412_v59  ;;  %v465_v58 = vld [vmem:[#allocation5 + $0x508] sm:$0xff]  ;;  %v464_v59 = vld [vmem:[#allocation5 + $0x500] sm:$0xff] }
  0xa4   : > { %704 = vmatpush2.msra.mxu1 %v402_v60  ;;  %588 = vmatprep.subr.mxu0 %v407_v61  ;;  %v459_v60 = vld [vmem:[#allocation5 + $0x4d8] sm:$0xff]  ;;  %v458_v61 = vld [vmem:[#allocation5 + $0x4d0] sm:$0xff] }
  0xa5   : > { %706 = vmatmul.mubr.f32.vlgmr.msra.gmra.mxu1 %v3513_v62  ;;  %589 = vmatpush2.msra.mxu0 %v406_v63  ;;  %v453_v63 = vld [vmem:[#allocation5 + $0x4a8] sm:$0xff] }
  0xa6   : > { %711 = vmatprep.mubr.f32.mxu1 %v3516_v0  ;;  %590 = vmatprep.subr.mxu0 %v401_v1  ;;  %v452_v1 = vld [vmem:[#allocation5 + $0x4a0] sm:$0xff] }
  0xa7   : > { %591 = vmatpush2.msra.mxu0 %v400_v2  ;;  %592 = vmatprep.mubr.f32.mxu0 %v3509_v51  ;;  %v447_v2 = vld [vmem:[#allocation5 + $0x478] sm:$0xff] }
  0xa8   : > { %593 = vmatmul.mubr.f32.vlgmr.msra.gmra.mxu0 %v3513_v62  ;;  %754 = vmatprep.subr.mxu0 %v399_v3  ;;  %v446_v3 = vld [vmem:[#allocation5 + $0x470] sm:$0xff] }
  0xa9   : > { %712 = vmatmul.mubr.f32.gmra.mxu1 %v3521_v4  ;;  %598 = vmatprep.mubr.f32.mxu0 %v3516_v0 }
  0xaa   : > { %717 = vmatprep.mubr.f32.mxu1 %v3525_v5  ;;  %755 = vmatpush1.msra.mxu0 %v398_v6  ;;  %v441_v6 = vld [vmem:[#allocation5 + $0x448] sm:$0xff] }
  0xab   : > { %756 = vmatprep.subr.mxu0 %v393_v7  ;;  %v440_v7 = vld [vmem:[#allocation5 + $0x440] sm:$0xff] }
  0xac   : > { %599 = vmatmul.mubr.f32.gmra.mxu0 %v3521_v4 }
  0xad   : > { %718 = vmatmul.mubr.f32.gmra.mxu1 %v3532_v8  ;;  %604 = vmatprep.mubr.f32.mxu0 %v3525_v5 }
  0xae   : > { %723 = vmatprep.mubr.f32.mxu1 %v3535_v9  ;;  %757 = vmatpush1.msra.mxu0 %v392_v10  ;;  %v435_v10 = vld [vmem:[#allocation5 + $0x418] sm:$0xff] }
  0xaf   : > { %758 = vmatprep.subr.mxu0 %v387_v11  ;;  %v434_v11 = vld [vmem:[#allocation5 + $0x410] sm:$0xff] }
  0xb0   : > { %605 = vmatmul.mubr.f32.gmra.mxu0 %v3532_v8 }
  0xb1   : > { %724 = vmatmul.mubr.f32.gmra.mxu1 %v3542_v12  ;;  %610 = vmatprep.mubr.f32.mxu0 %v3535_v9 }
  0xb2   : > { %729 = vmatprep.mubr.f32.mxu1 %v3545_v13  ;;  %759 = vmatpush1.msra.mxu0 %v386_v14  ;;  %v429_v14 = vld [vmem:[#allocation5 + $0x3e8] sm:$0xff] }
  0xb3   : > { %760 = vmatprep.subr.mxu0 %v381_v15  ;;  %v428_v15 = vld [vmem:[#allocation5 + $0x3e0] sm:$0xff] }
  0xb4   : > { %611 = vmatmul.mubr.f32.gmra.mxu0 %v3542_v12 }
  0xb5   : > { %730 = vmatmul.mubr.f32.gmra.mxu1 %v3552_v16  ;;  %616 = vmatprep.mubr.f32.mxu0 %v3545_v13 }
  0xb6   : > { %735 = vmatprep.mubr.f32.mxu1 %v3555_v17  ;;  %761 = vmatpush1.msra.mxu0 %v380_v18  ;;  %v423_v18 = vld [vmem:[#allocation5 + $0x3b8] sm:$0xff] }
  0xb7   : > { %762 = vmatprep.subr.mxu0 %v375_v19  ;;  %v422_v19 = vld [vmem:[#allocation5 + $0x3b0] sm:$0xff] }
  0xb8   : > { %617 = vmatmul.mubr.f32.gmra.mxu0 %v3552_v16 }
  0xb9   : > { %736 = vmatmul.mubr.f32.gmra.mxu1 %v3562_v20  ;;  %622 = vmatprep.mubr.f32.mxu0 %v3555_v17 }
  0xba   : > { %741 = vmatprep.mubr.f32.mxu1 %v3565_v21  ;;  %763 = vmatpush1.msra.mxu0 %v374_v22  ;;  %v417_v22 = vld [vmem:[#allocation5 + $0x388] sm:$0xff] }
  0xbb   : > { %764 = vmatprep.subr.mxu0 %v369_v23  ;;  %v416_v23 = vld [vmem:[#allocation5 + $0x380] sm:$0xff] }
  0xbc   : > { %623 = vmatmul.mubr.f32.gmra.mxu0 %v3562_v20 }
  0xbd   : > { %742 = vmatmul.mubr.f32.gmra.mxu1 %v3572_v24  ;;  %628 = vmatprep.mubr.f32.mxu0 %v3565_v21 }
  0xbe   : > { %747 = vmatprep.mubr.f32.mxu1 %v3575_v25  ;;  %765 = vmatpush1.msra.mxu0 %v368_v26  ;;  %v411_v26 = vld [vmem:[#allocation5 + $0x358] sm:$0xff] }
  0xbf   : > { %766 = vmatprep.subr.mxu0 %v363_v27  ;;  %v410_v27 = vld [vmem:[#allocation5 + $0x350] sm:$0xff] }
  0xc0   : > { %629 = vmatmul.mubr.f32.gmra.mxu0 %v3572_v24 }
  0xc1   : > { %748 = vmatmul.mubr.f32.gmra.mxu1 %v3582_v28  ;;  %634 = vmatprep.mubr.f32.mxu0 %v3575_v25 }
  0xc2   : > { %767 = vmatpush1.msra.mxu0 %v362_v29  ;;  %v405_v29 = vld [vmem:[#allocation5 + $0x328] sm:$0xff] }
  0xc3   : > { %768 = vmatprep.subr.mxu0 %v357_v30  ;;  %v404_v30 = vld [vmem:[#allocation5 + $0x320] sm:$0xff] }
  0xc4   : > { %635 = vmatmul.mubr.f32.gmra.mxu0 %v3582_v28 }
  0xc5   : > { %769 = vmatpush1.msra.mxu0 %v356_v31  ;;  %818 = vmatprep.mubr.f32.mxu0 %v3509_v51  ;;  %v488_v51 = vld [vmem:[#allocation5 + $0x5c0] sm:$0xff] }
  0xc6   : > { %770 = vmatprep.subr.mxu0 %v351_v32 }
  0xc7   : > { %771 = vmatpush1.msra.mxu0 %v350_v33 }
  0xc8   : > { %772 = vmatprep.subr.mxu0 %v345_v34 }
  0xc9   : > { %773 = vmatpush1.msra.mxu0 %v344_v35 }
  0xca   : > { %774 = vmatprep.subr.mxu0 %v339_v36 }
  0xcb   : > { %775 = vmatpush1.msra.mxu0 %v338_v37 }
  0xcc   : > { %776 = vmatprep.subr.mxu0 %v333_v38 }
  0xcd   : > { %777 = vmatpush1.msra.mxu0 %v332_v39 }
  0xce   : > { %778 = vmatprep.subr.mxu0 %v327_v40 }
  0xcf   : > { %779 = vmatpush1.msra.mxu0 %v326_v41 }
  0xd0   : > { %780 = vmatprep.subr.mxu0 %v321_v42 }
  0xd1   : > { %781 = vmatpush1.msra.mxu0 %v320_v43 }
  0xd2   : > { %782 = vmatprep.subr.mxu0 %v315_v44 }
  0xd3   : > { %783 = vmatpush1.msra.mxu0 %v314_v45 }
  0xd4   : > { %784 = vmatprep.subr.mxu0 %v309_v46 }
  0xd5   : > { %785 = vmatpush1.msra.mxu0 %v308_v47 }
  0xd6   : > { %786 = vmatprep.subr.mxu0 %v495_v48 }
  0xd7   : > { %787 = vmatpush2.msra.mxu0 %v494_v49 }
  0xd8   : > { %788 = vmatprep.subr.mxu0 %v489_v50 }
  0xd9   : > { %789 = vmatpush2.msra.mxu0 %v488_v51 }
  0xda   : > { %790 = vmatprep.subr.mxu0 %v483_v52 }
  0xdb   : > { %791 = vmatpush2.msra.mxu0 %v482_v53 }
  0xdc   : > { %792 = vmatprep.subr.mxu0 %v477_v54 }
  0xdd   : > { %793 = vmatpush2.msra.mxu0 %v476_v55 }
  0xde   : > { %794 = vmatprep.subr.mxu0 %v471_v56 }
  0xdf   : > { %795 = vmatpush2.msra.mxu0 %v470_v57 }
  0xe0   : > { %796 = vmatprep.subr.mxu0 %v465_v58 }
  0xe1   : > { %797 = vmatpush2.msra.mxu0 %v464_v59 }
  0xe2   : > { %798 = vmatprep.subr.mxu0 %v459_v60 }
  0xe3   : > { %799 = vmatpush2.msra.mxu0 %v458_v61 }
  0xe4   : > { %800 = vmatprep.subr.mxu0 %v453_v63 }
  0xe5   : > { %801 = vmatpush2.msra.mxu0 %v452_v1 }
  0xe6   : > { %802 = vmatprep.subr.mxu0 %v447_v2 }
  0xe7   : > { %803 = vmatpush2.msra.mxu0 %v446_v3 }
  0xe8   : > { %804 = vmatprep.subr.mxu0 %v441_v6 }
  0xe9   : > { %805 = vmatpush2.msra.mxu0 %v440_v7 }
  0xea   : > { %806 = vmatprep.subr.mxu0 %v435_v10 }
  0xeb   : > { %807 = vmatpush2.msra.mxu0 %v434_v11 }
  0xec   : > { %808 = vmatprep.subr.mxu0 %v429_v14 }
  0xed   : > { %809 = vmatpush2.msra.mxu0 %v428_v15 }
  0xee   : > { %810 = vmatprep.subr.mxu0 %v423_v18 }
  0xef   : > { %811 = vmatpush2.msra.mxu0 %v422_v19 }
  0xf0   : > { %812 = vmatprep.subr.mxu0 %v417_v22 }
  0xf1   : > { %813 = vmatpush2.msra.mxu0 %v416_v23 }
  0xf2   : > { %814 = vmatprep.subr.mxu0 %v411_v26 }
  0xf3   : > { %815 = vmatpush2.msra.mxu0 %v410_v27 }
  0xf4   : > { %816 = vmatprep.subr.mxu0 %v405_v29 }
  0xf5   : > { %817 = vmatpush2.msra.mxu0 %v404_v30 }
  0xf6   : > { %819 = vmatmul.mubr.f32.vlgmr.msra.gmra.mxu0 %v3513_v62  ;;  %v498_v62 = vlaneseq }
  0xf7   : > { %824 = vmatprep.mubr.f32.mxu0 %v3516_v0 }
  0xf8   : > { %v3604_v0 = vshrl.u32 %v498_v62, 7 }
  0xfa   : > { %825 = vmatmul.mubr.f32.gmra.mxu0 %v3521_v4  ;;  %v512_v4 = vsub.s32 3, %v3604_v0 }
  0xfb   : > { %830 = vmatprep.mubr.f32.mxu0 %v3525_v5  ;;  %v500_v5 = vsub.s32 0, %v3604_v0 }
  0xfe   : > { %831 = vmatmul.mubr.f32.gmra.mxu0 %v3532_v8  ;;  %v3608_v8 = vld [vmem:[#allocation7] sm:$0x3f] }
  0xff   : > { %836 = vmatprep.mubr.f32.mxu0 %v3535_v9  ;;  %v504_v9 = vsub.s32 1, %v3604_v0 }
 0x102   : > { %837 = vmatmul.mubr.f32.gmra.mxu0 %v3542_v12  ;;  %v508_v12 = vsub.s32 2, %v3604_v0 }
 0x103   : > { %842 = vmatprep.mubr.f32.mxu0 %v3545_v13  ;;  %v3613_v13 = vrot.slane %v3608_v8, %v512_v4 }
 0x106   : > { %843 = vmatmul.mubr.f32.gmra.mxu0 %v3552_v16 }
 0x107   : > { %848 = vmatprep.mubr.f32.mxu0 %v3555_v17  ;;  %v3618_v17 = vrot.slane %v3608_v8, %v500_v5 }
 0x10a   : > { %849 = vmatmul.mubr.f32.gmra.mxu0 %v3562_v20 }
 0x10b   : > { %854 = vmatprep.mubr.f32.mxu0 %v3565_v21  ;;  %v3623_v21 = vrot.slane %v3608_v8, %v504_v9 }
 0x10e   : > { %855 = vmatmul.mubr.f32.gmra.mxu0 %v3572_v24  ;;  %v3626_v24 = vrot.slane %v3608_v8, %v508_v12 }
 0x10f   : > { %860 = vmatprep.mubr.f32.mxu0 %v3575_v25 }
 0x112   : > { %861 = vmatmul.mubr.f32.gmra.mxu0 %v3582_v28 }
 0x165   : > { %v707_v16 = vpop.f32.mrf.mxu1 }
 0x166   : > { %v708_v37 = vadd.f32 %v707_v16, %v3626_v24 }
 0x167   : > { %v709_v20 = vpop.f32.mrf.mxu1 }
 0x168   : > { %v3629_v25 = vadd.f32 %v709_v20, %v3613_v13  ;;  %v594_v28 = vpop.f32.mrf.mxu0 }
 0x169   : > { %v713_v31 = vpop.f32.mrf.mxu1  ;;  %v595_v32 = vadd.f32 %v594_v28, %v3618_v17 }
 0x16a   : > { %v714_v33 = vadd.f32 %v713_v31, %v3626_v24  ;;  %v596_v34 = vpop.f32.mrf.mxu0 }
 0x16b   : > { %v715_v35 = vpop.f32.mrf.mxu1  ;;  %v3634_v36 = vadd.f32 %v596_v34, %v3623_v21  ;;  %2869 = vmatprep.mubr.f32.mxu1 %v595_v32 }
 0x16c   : > { %v3638_v38 = vadd.f32 %v715_v35, %v3613_v13  ;;  %2865 = vmatprep.subr.mxu1 %v714_v33  ;;  %v600_v39 = vpop.f32.mrf.mxu0 }
 0x16d   : > { %v719_v40 = vpop.f32.mrf.mxu1  ;;  %2866 = vmatpush3.xpose.msra.mxu1 %v714_v33  ;;  %v601_v45 = vadd.f32 %v600_v39, %v3618_v17  ;;  %v520_v39 = vsub.s32 5, %v3604_v0 }
 0x16e   : > { %2867 = vmatprep.subr.mxu1 %v708_v37  ;;  %v602_v41 = vpop.f32.mrf.mxu0  ;;  %v720_v53 = vadd.f32 %v719_v40, %v3626_v24 }
 0x16f   : > { %v721_v42 = vpop.f32.mrf.mxu1  ;;  %v3641_v43 = vadd.f32 %v602_v41, %v3623_v21  ;;  %v3687_v41 = vrot.slane %v3608_v8, %v520_v39 }
 0x170   : > { %v3644_v44 = vadd.f32 %v721_v42, %v3613_v13  ;;  %v606_v46 = vpop.f32.mrf.mxu0 }
 0x171   : > { %v725_v47 = vpop.f32.mrf.mxu1  ;;  %2868 = vmatpush3.xpose.msra.mxu1 %v708_v37  ;;  %v607_v48 = vadd.f32 %v606_v46, %v3618_v17 }
 0x172   : > { %v726_v49 = vadd.f32 %v725_v47, %v3626_v24  ;;  %v608_v50 = vpop.f32.mrf.mxu0 }
 0x173   : > { %v727_v51 = vpop.f32.mrf.mxu1  ;;  %v3650_v52 = vadd.f32 %v608_v50, %v3623_v21 }
 0x174   : > { %v3654_v54 = vadd.f32 %v727_v51, %v3613_v13  ;;  %2870 = vmatmul.mubr.f32.vlgmr.msra.gmra.mxu1 %v601_v45  ;;  %2872 = vmatprep.subr.mxu1 %v726_v49  ;;  %v612_v55 = vpop.f32.mrf.mxu0 }
 0x175   : > { %v731_v56 = vpop.f32.mrf.mxu1  ;;  %2873 = vmatpush3.xpose.msra.mxu1 %v726_v49  ;;  %2876 = vmatprep.mubr.f32.mxu1 %v607_v48  ;;  %v613_v60 = vadd.f32 %v612_v55, %v3618_v17 }
 0x176   : > { %2874 = vmatprep.subr.mxu1 %v720_v53  ;;  %v614_v57 = vpop.f32.mrf.mxu0  ;;  %v732_v10 = vadd.f32 %v731_v56, %v3626_v24 }
 0x177   : > { %v733_v58 = vpop.f32.mrf.mxu1  ;;  %v3657_v59 = vadd.f32 %v614_v57, %v3623_v21 }
 0x178   : > { %v618_v61 = vpop.f32.mrf.mxu0  ;;  %v734_v18 = vadd.f32 %v733_v58, %v3613_v13 }
 0x179   : > { %v737_v63 = vpop.f32.mrf.mxu1  ;;  %2875 = vmatpush3.xpose.msra.mxu1 %v720_v53  ;;  %v619_v1 = vadd.f32 %v618_v61, %v3618_v17 }
 0x17a   : > { %v738_v2 = vadd.f32 %v737_v63, %v3626_v24  ;;  %v620_v3 = vpop.f32.mrf.mxu0 }
 0x17b   : > { %v739_v6 = vpop.f32.mrf.mxu1  ;;  %v621_v7 = vadd.f32 %v620_v3, %v3623_v21 }
 0x17c   : > { %v740_v11 = vadd.f32 %v739_v6, %v3613_v13  ;;  %2877 = vmatmul.mubr.f32.vlgmr.msra.gmra.mxu1 %v613_v60  ;;  %2879 = vmatprep.subr.mxu1 %v738_v2  ;;  %v624_v14 = vpop.f32.mrf.mxu0 }
 0x17d   : > { %v743_v15 = vpop.f32.mrf.mxu1  ;;  %2880 = vmatpush3.xpose.msra.mxu1 %v738_v2  ;;  %2883 = vmatprep.mubr.f32.mxu1 %v619_v1  ;;  %v625_v26 = vadd.f32 %v624_v14, %v3618_v17 }
 0x17e   : > { %2881 = vmatprep.subr.mxu1 %v732_v10  ;;  %v626_v19 = vpop.f32.mrf.mxu0  ;;  %2935 = vmatprep.subr.mxu0 %v740_v11  ;;  %v744_v16 = vadd.f32 %v743_v15, %v3626_v24 }
 0x17f   : > { %v745_v22 = vpop.f32.mrf.mxu1  ;;  %2936 = vmatpush3.xpose.msra.mxu0 %v740_v11  ;;  %2939 = vmatprep.mubr.f32.mxu0 %v621_v7  ;;  %v627_v20 = vadd.f32 %v626_v19, %v3623_v21 }
 0x180   : > { %v3667_v23 = vadd.f32 %v745_v22, %v3613_v13  ;;  %v630_v27 = vpop.f32.mrf.mxu0  ;;  %2937 = vmatprep.subr.mxu0 %v734_v18 }
 0x181   : > { %v749_v29 = vpop.f32.mrf.mxu1  ;;  %2882 = vmatpush3.xpose.msra.mxu1 %v732_v10  ;;  %v631_v30 = vadd.f32 %v630_v27, %v3618_v17 }
 0x182   : > { %v750_v62 = vadd.f32 %v749_v29, %v3626_v24  ;;  %v632_v4 = vpop.f32.mrf.mxu0  ;;  %v516_v24 = vsub.s32 4, %v3604_v0 }
 0x183   : > { %v3673_v12 = vadd.f32 %v632_v4, %v3623_v21  ;;  %2938 = vmatpush3.xpose.msra.mxu0 %v734_v18  ;;  %v3724_v10 = vpop.f32.mrf.mxu1 }
 0x184   : > { %2884 = vmatmul.mubr.f32.vlgmr.msra.gmra.mxu1 %v625_v26  ;;  %2886 = vmatprep.subr.mxu1 %v750_v62  ;;  %v636_v28 = vpop.f32.mrf.mxu0  ;;  %v3683_v37 = vrot.slane %v3608_v8, %v516_v24 }
 0x185   : > { %2887 = vmatpush3.xpose.msra.mxu1 %v750_v62  ;;  %2890 = vmatprep.mubr.f32.mxu1 %v631_v30  ;;  %v637_v33 = vadd.f32 %v636_v28, %v3618_v17 }
 0x186   : > { %2888 = vmatprep.subr.mxu1 %v744_v16  ;;  %2940 = vmatmul.mubr.f32.vlgmr.msra.gmra.mxu0 %v627_v20  ;;  %v638_v31 = vpop.f32.mrf.mxu0 }
 0x187   : > { %v3678_v32 = vadd.f32 %v638_v31, %v3623_v21 }
 0x189   : > { %2889 = vmatpush3.xpose.msra.mxu1 %v744_v16 }
 0x18c   : > { %2891 = vmatmul.mubr.f32.vlgmr.msra.gmra.mxu1 %v637_v33 }
 0x1b6   : > { %v820_v34 = vpop.f32.mrf.mxu0 }
 0x1b7   : > { %v821_v21 = vadd.f32 %v820_v34, %v3683_v37 }
 0x1b8   : > { %v822_v35 = vpop.f32.mrf.mxu0 }
 0x1b9   : > { %v823_v46 = vadd.f32 %v822_v35, %v3687_v41 }
 0x1ba   : > { %v826_v40 = vpop.f32.mrf.mxu0 }
 0x1bb   : > { %v827_v17 = vadd.f32 %v826_v40, %v3683_v37 }
 0x1bc   : > { %v828_v42 = vpop.f32.mrf.mxu0 }
 0x1bd   : > { %v829_v47 = vadd.f32 %v828_v42, %v3687_v41  ;;  %2893 = vmatprep.subr.mxu1 %v827_v17 }
 0x1be   : > { %v832_v45 = vpop.f32.mrf.mxu0  ;;  %2894 = vmatpush3.msra.mxu1 %v827_v17 }
 0x1bf   : > { %v3694_v48 = vadd.f32 %v832_v45, %v3683_v37  ;;  %2895 = vmatprep.subr.mxu1 %v821_v21  ;;  %2949 = vmatprep.subr.mxu0 %v829_v47 }
 0x1c0   : > { %v834_v49 = vpop.f32.mrf.mxu0  ;;  %2896 = vmatpush3.msra.mxu1 %v821_v21  ;;  %2950 = vmatpush3.msra.mxu0 %v829_v47 }
 0x1c1   : > { %v3697_v8 = vadd.f32 %v834_v49, %v3687_v41  ;;  %2951 = vmatprep.subr.mxu0 %v823_v46 }
 0x1c2   : > { %v838_v50 = vpop.f32.mrf.mxu0  ;;  %2952 = vmatpush3.msra.mxu0 %v823_v46 }
 0x1c3   : > { %v3700_v53 = vadd.f32 %v838_v50, %v3683_v37 }
 0x1c4   : > { %v840_v51 = vpop.f32.mrf.mxu0 }
 0x1c5   : > { %v3703_v56 = vadd.f32 %v840_v51, %v3687_v41  ;;  %2900 = vmatprep.subr.mxu1 %v3700_v53 }
 0x1c6   : > { %v844_v55 = vpop.f32.mrf.mxu0 }
 0x1c7   : > { %v3706_v57 = vadd.f32 %v844_v55, %v3683_v37 }
 0x1c8   : > { %v846_v58 = vpop.f32.mrf.mxu0 }
 0x1c9   : > { %v3710_v60 = vadd.f32 %v846_v58, %v3687_v41 }
 0x1ca   : > { %v850_v61 = vpop.f32.mrf.mxu0 }
 0x1cb   : > { %v3713_v1 = vadd.f32 %v850_v61, %v3683_v37 }
 0x1cc   : > { %v852_v63 = vpop.f32.mrf.mxu0 }
 0x1cd   : > { %v3718_v3 = vadd.f32 %v852_v63, %v3687_v41 }
 0x1ce   : > { %v3715_v2 = vpop.f32.mrf.mxu0 }
 0x1cf   : > { %2963 = vmatprep.subr.mxu0 %v3718_v3 }
 0x1d0   : > { %v858_v6 = vpop.f32.mrf.mxu0 }
 0x1d1   : > { %v3722_v7 = vadd.f32 %v858_v6, %v3687_v41 }
 0x234   : > { %v2871_v11 = vpop.f32.mrf.mxu1 }
 0x235   : > { %v1168_v18 = vmul.f32 0.088388346, %v2871_v11 }
 0x236   : > { %v933_v14 = vpop.f32.mrf.mxu1 }
 0x237   : > { %v1167_v15 = vmul.f32 0.088388346, %v933_v14  ;;  %v1179_v26 = vsel %vm1175_vm0, %v1168_v18, -inf }
 0x239   : > { %v1176_v19 = vsel %vm1175_vm0, %v1167_v15, -inf }
 0x23a   : > { %1177 = vmax.xlane.f32.xlu0 %v1176_v19 }
 0x23c   : > { %v2878_v22 = vpop.f32.mrf.mxu1 }
 0x23d   : > { %v1170_v30 = vmul.f32 0.088388346, %v2878_v22 }
 0x23e   : > { %1180 = vmax.xlane.f32.xlu0 %v1179_v26  ;;  %v1008_v27 = vpop.f32.mrf.mxu1 }
 0x23f   : > { %v1169_v29 = vmul.f32 0.088388346, %v1008_v27  ;;  %v1185_v20 = vsel %vm1175_vm0, %v1170_v30, -inf }
 0x241   : > { %v1182_v62 = vsel %vm1175_vm0, %v1169_v29, -inf }
 0x242   : > { %1183 = vmax.xlane.f32.xlu1 %v1182_v62 }
 0x244   : > { %v2885_v4 = vpop.f32.mrf.mxu1 }
 0x245   : > { %v1172_v16 = vmul.f32 0.088388346, %v2885_v4 }
 0x246   : > { %1186 = vmax.xlane.f32.xlu1 %v1185_v20  ;;  %v1083_v28 = vpop.f32.mrf.mxu1 }
 0x247   : > { %v1171_v31 = vmul.f32 0.088388346, %v1083_v28  ;;  %v1191_v33 = vsel %vm1175_vm0, %v1172_v16, -inf }
 0x249   : > { %v1188_v34 = vsel %vm1175_vm0, %v1171_v31, -inf }
 0x24a   : > { %1192 = vmax.xlane.f32.xlu1 %v1191_v33  ;;  %1189 = vmax.xlane.f32.xlu0 %v1188_v34 }
 0x24c   : > { %v2892_v24 = vpop.f32.mrf.mxu1 }
 0x24d   : > { %v1174_v35 = vmul.f32 0.088388346, %v2892_v24 }
 0x24e   : > { %v1158_v39 = vpop.f32.mrf.mxu1 }
 0x24f   : > { %v1173_v40 = vmul.f32 0.088388346, %v1158_v39  ;;  %v1197_v42 = vsel %vm1175_vm0, %v1174_v35, -inf }
 0x250   : > { %1198 = vmax.xlane.f32.xlu1 %v1197_v42 }
 0x251   : > { %v1194_v21 = vsel %vm1175_vm0, %v1173_v40, -inf }
 0x252   : > { %1195 = vmax.xlane.f32.xlu0 %v1194_v21 }
 0x2c3   : > { %v1178_v17 = vpop.xlane.xlu0 %1177 }
 0x2c4   : > { %v1200_v45 = vsub.f32 %v1167_v15, %v1178_v17 }
 0x2c6   : > { %v1208_v46 = vmul.f32 1.442695, %v1200_v45 }
 0x2c7   : > { %v1181_v47 = vpop.xlane.xlu0 %1180 }
 0x2c8   : > { %3061 = vpow2.f32 %v1208_v46  ;;  %v1201_v49 = vsub.f32 %v1168_v18, %v1181_v47 }
 0x2ca   : > { %v1210_v50 = vmul.f32 1.442695, %v1201_v49 }
 0x2cb   : > { %v1184_v51 = vpop.xlane.xlu1 %1183 }
 0x2cc   : > { %3063 = vpow2.f32 %v1210_v50  ;;  %v1202_v55 = vsub.f32 %v1169_v29, %v1184_v51 }
 0x2ce   : > { %v1212_v58 = vmul.f32 1.442695, %v1202_v55 }
 0x2cf   : > { %v1187_v61 = vpop.xlane.xlu1 %1186 }
 0x2d0   : > { %3065 = vpow2.f32 %v1212_v58  ;;  %v1203_v63 = vsub.f32 %v1170_v30, %v1187_v61 }
 0x2d2   : > { %v1214_v6 = vmul.f32 1.442695, %v1203_v63 }
 0x2d3   : > { %v1193_v11 = vpop.xlane.xlu1 %1192  ;;  %v1190_v14 = vpop.xlane.xlu0 %1189 }
 0x2d4   : > { %3067 = vpow2.f32 %v1214_v6  ;;  %v1205_v19 = vsub.f32 %v1172_v16, %v1193_v11  ;;  %v1204_v22 = vsub.f32 %v1171_v31, %v1190_v14 }
 0x2d5   : > { %v3062_v26 = vpop.eup %3061 }
 0x2d6   : > { %v1218_v15 = vmul.f32 1.442695, %v1205_v19  ;;  %v1216_v27 = vmul.f32 1.442695, %v1204_v22  ;;  %v1224_v62 = vsel %vm1175_vm0, %v3062_v26, 0.0 }
 0x2d7   : > { %1225 = vadd.xlane.f32.xlu0 %v1224_v62 }
 0x2d8   : > { %3069 = vpow2.f32 %v1218_v15 }
 0x2d9   : > { %v3064_v18 = vpop.eup %3063  ;;  %3071 = vpow2.f32 %v1216_v27  ;;  %v1199_v29 = vpop.xlane.xlu1 %1198 }
 0x2da   : > { %v1207_v4 = vsub.f32 %v1174_v35, %v1199_v29  ;;  %v1227_v20 = vsel %vm1175_vm0, %v3064_v18, 0.0 }
 0x2db   : > { %1228 = vadd.xlane.f32.xlu1 %v1227_v20  ;;  %v1196_v30 = vpop.xlane.xlu0 %1195 }
 0x2dc   : > { %v1222_v28 = vmul.f32 1.442695, %v1207_v4  ;;  %v1206_v33 = vsub.f32 %v1173_v40, %v1196_v30  ;;  %v857_v30 = vadd.f32 %v3715_v2, %v3683_v37 }
 0x2dd   : > { %v3066_v34 = vpop.eup %3065 }
 0x2de   : > { %3073 = vpow2.f32 %v1222_v28  ;;  %v1220_v16 = vmul.f32 1.442695, %v1206_v33  ;;  %v1230_v31 = vsel %vm1175_vm0, %v3066_v34, 0.0 }
 0x2df   : > { %1231 = vadd.xlane.f32.xlu0 %v1230_v31 }
 0x2e0   : > { %3075 = vpow2.f32 %v1220_v16 }
 0x2e1   : > { %v3068_v24 = vpop.eup %3067 }
 0x2e2   : > { %v1233_v39 = vsel %vm1175_vm0, %v3068_v24, 0.0 }
 0x2e3   : > { %1234 = vadd.xlane.f32.xlu1 %v1233_v39 }
 0x2e5   : > { %v3070_v42 = vpop.eup %3069 }
 0x2e6   : > { %v3072_v21 = vpop.eup %3071  ;;  %v1239_v35 = vsel %vm1175_vm0, %v3070_v42, 0.0 }
 0x2e7   : > { %1240 = vadd.xlane.f32.xlu1 %v1239_v35  ;;  %v1236_v17 = vsel %vm1175_vm0, %v3072_v21, 0.0 }
 0x2e8   : > { %1237 = vadd.xlane.f32.xlu0 %v1236_v17 }
 0x2eb   : > { %v3074_v40 = vpop.eup %3073 }
 0x2ec   : > { %v1245_v45 = vsel %vm1175_vm0, %v3074_v40, 0.0 }
 0x2ed   : > { %v3076_v46 = vpop.eup %3075  ;;  %1246 = vadd.xlane.f32.xlu1 %v1245_v45 }
 0x2ee   : > { %v1242_v47 = vsel %vm1175_vm0, %v3076_v46, 0.0 }
 0x2ef   : > { %1243 = vadd.xlane.f32.xlu0 %v1242_v47 }
 0x360   : > { %v1226_v49 = vpop.xlane.xlu0 %1225 }
 0x361   : > { %3077 = vrcp.f32 %v1226_v49 }
 0x364   : > { %v1229_v50 = vpop.xlane.xlu1 %1228 }
 0x365   : > { %3079 = vrcp.f32 %v1229_v50 }
 0x368   : > { %v1232_v51 = vpop.xlane.xlu0 %1231 }
 0x369   : > { %3081 = vrcp.f32 %v1232_v51 }
 0x36c   : > { %v1235_v55 = vpop.xlane.xlu1 %1234 }
 0x36d   : > { %3083 = vrcp.f32 %v1235_v55 }
 0x36e   : > { %v3078_v58 = vpop.eup %3077 }
 0x36f   : > { %v1249_v61 = vmul.f32 %v3078_v58, %v3062_v26 }
 0x370   : > { %v1241_v63 = vpop.xlane.xlu1 %1240 }
 0x371   : > { %3085 = vrcp.f32 %v1241_v63  ;;  %v1238_v6 = vpop.xlane.xlu0 %1237  ;;  %2897 = vmatprep.mubr.msk.f32.mxu1 %vm1175_vm0, %v1249_v61 }
 0x372   : > { %v3080_v11 = vpop.eup %3079  ;;  %3087 = vrcp.f32 %v1238_v6 }
 0x373   : > { %v1251_v14 = vmul.f32 %v3080_v11, %v3064_v18  ;;  %v862_v18 = vpop.f32.mrf.mxu0 }
 0x374   : > { %v863_v29 = vadd.f32 %v862_v18, %v3683_v37  ;;  %v752_v37 = vadd.f32 %v3724_v10, %v3613_v13 }
 0x375   : > { %2898 = vmatmul.mubr.msk.f32.vlgmr.msra.gmra.mxu1 %vm1175_vm0, %v1251_v14 }
 0x376   : > { %v3082_v19 = vpop.eup %3081  ;;  %v1247_v22 = vpop.xlane.xlu1 %1246  ;;  %2901 = vmatpush3.msra.mxu1 %v3700_v53 }
 0x377   : > { %v1253_v15 = vmul.f32 %v3082_v19, %v3066_v34  ;;  %2902 = vmatprep.subr.mxu1 %v3694_v48  ;;  %3089 = vrcp.f32 %v1247_v22 }
 0x378   : > { %v1244_v27 = vpop.xlane.xlu0 %1243  ;;  %2903 = vmatpush3.msra.mxu1 %v3694_v48 }
 0x379   : > { %3091 = vrcp.f32 %v1244_v27  ;;  %2904 = vmatprep.mubr.msk.f32.mxu1 %vm1175_vm0, %v1253_v15  ;;  %2907 = vmatprep.subr.mxu1 %v3713_v1 }
 0x37a   : > { %v3084_v26 = vpop.eup %3083 }
 0x37b   : > { %v1255_v62 = vmul.f32 %v3084_v26, %v3068_v24 }
 0x37d   : > { %2905 = vmatmul.mubr.msk.f32.vlgmr.msra.gmra.mxu1 %vm1175_vm0, %v1255_v62 }
 0x37e   : > { %v3086_v53 = vpop.eup %3085  ;;  %2908 = vmatpush3.msra.mxu1 %v3713_v1 }
 0x37f   : > { %v3088_v4 = vpop.eup %3087  ;;  %2909 = vmatprep.subr.mxu1 %v3706_v57  ;;  %v1259_v20 = vmul.f32 %v3086_v53, %v3070_v42 }
 0x380   : > { %2910 = vmatpush3.msra.mxu1 %v3706_v57  ;;  %v1257_v48 = vmul.f32 %v3088_v4, %v3072_v21 }
 0x381   : > { %2914 = vmatprep.subr.mxu1 %v863_v29 }
 0x382   : > { %2911 = vmatprep.mubr.msk.f32.mxu1 %vm1175_vm0, %v1257_v48 }
 0x383   : > { %2912 = vmatmul.mubr.msk.f32.vlgmr.msra.gmra.mxu1 %vm1175_vm0, %v1259_v20 }
 0x384   : > { %2915 = vmatpush3.msra.mxu1 %v863_v29  ;;  %v3090_v28 = vpop.eup %3089 }
 0x385   : > { %2916 = vmatprep.subr.mxu1 %v857_v30  ;;  %v1263_v34 = vmul.f32 %v3090_v28, %v3074_v40 }
 0x386   : > { %v3092_v33 = vpop.eup %3091  ;;  %2917 = vmatpush3.msra.mxu1 %v857_v30 }
 0x387   : > { %2921 = vmatprep.subr.mxu1 %v3638_v38  ;;  %v1261_v1 = vmul.f32 %v3092_v33, %v3076_v46 }
 0x389   : > { %2918 = vmatprep.mubr.msk.f32.mxu1 %vm1175_vm0, %v1261_v1 }
 0x38a   : > { %2919 = vmatmul.mubr.msk.f32.vlgmr.msra.gmra.mxu1 %vm1175_vm0, %v1263_v34 }
 0x38b   : > { %2922 = vmatpush3.xpose.msra.mxu1 %v3638_v38  ;;  %2925 = vmatprep.mubr.f32.mxu1 %v3634_v36 }
 0x38c   : > { %2923 = vmatprep.subr.mxu1 %v3629_v25 }
 0x38f   : > { %2924 = vmatpush3.xpose.msra.mxu1 %v3629_v25  ;;  %v864_v25 = vpop.f32.mrf.mxu0 }
 0x390   : > { %2928 = vmatprep.subr.mxu1 %v3654_v54  ;;  %v3781_v13 = vadd.f32 %v864_v25, %v3687_v41 }
 0x391   : > { %v2941_v2 = vpop.f32.mrf.mxu0 }
 0x392   : > { %2926 = vmatmul.mubr.f32.vlgmr.msra.gmra.mxu1 %v3641_v43  ;;  %v1925_v39 = vmul.f32 0.088388346, %v2941_v2 }
 0x393   : > { %2929 = vmatpush3.xpose.msra.mxu1 %v3654_v54  ;;  %2932 = vmatprep.mubr.f32.mxu1 %v3650_v52  ;;  %v1836_v31 = vpop.f32.mrf.mxu0 }
 0x394   : > { %2930 = vmatprep.subr.mxu1 %v3644_v44  ;;  %v1924_v35 = vmul.f32 0.088388346, %v1836_v31  ;;  %v1943_v40 = vsel %vm1175_vm0, %v1925_v39, -inf }
 0x396   : > { %v1940_v47 = vsel %vm1175_vm0, %v1924_v35, -inf }
 0x397   : > { %2931 = vmatpush3.xpose.msra.mxu1 %v3644_v44 }
 0x398   : > { %2942 = vmatprep.subr.mxu1 %v752_v37 }
 0x39a   : > { %2933 = vmatmul.mubr.f32.vlgmr.msra.gmra.mxu1 %v3657_v59 }
 0x39b   : > { %2943 = vmatpush3.xpose.msra.mxu1 %v752_v37  ;;  %2946 = vmatprep.mubr.f32.mxu1 %v3673_v12 }
 0x39c   : > { %2944 = vmatprep.subr.mxu1 %v3667_v23 }
 0x39f   : > { %2945 = vmatpush3.xpose.msra.mxu1 %v3667_v23 }
 0x3a0   : > { %2956 = vmatprep.subr.mxu1 %v3703_v56 }
 0x3a2   : > { %2947 = vmatmul.mubr.f32.vlgmr.msra.gmra.mxu1 %v3678_v32 }
 0x3a3   : > { %2957 = vmatpush3.msra.mxu1 %v3703_v56 }
 0x3a4   : > { %2958 = vmatprep.subr.mxu1 %v3697_v8 }
 0x3a5   : > { %2959 = vmatpush3.msra.mxu1 %v3697_v8 }
 0x3a6   : > { %2970 = vmatprep.subr.mxu1 %v3781_v13 }
 0x435   : > { %v3786_v36 = vpop.f32.mrf.mxu1 }
 0x437   : > { %v3788_v38 = vpop.f32.mrf.mxu1 }
 0x43d   : > { %v3790_v43 = vpop.f32.mrf.mxu1 }
 0x43f   : > { %v3792_v44 = vpop.f32.mrf.mxu1 }
 0x443   : > { %v3794_v52 = vpop.f32.mrf.mxu1 }
 0x445   : > { %v3796_v54 = vpop.f32.mrf.mxu1 }
 0x44a   : > { %v3798_v59 = vpop.f32.mrf.mxu1 }
 0x44c   : > { %v3800_v23 = vpop.f32.mrf.mxu1 }
 0x452   : > { %v2927_v12 = vpop.f32.mrf.mxu1 }
 0x453   : > { %v1921_v32 = vmul.f32 0.088388346, %v2927_v12 }
 0x454   : > { %v1686_v41 = vpop.f32.mrf.mxu1 }
 0x455   : > { %v1920_v8 = vmul.f32 0.088388346, %v1686_v41  ;;  %v1931_v56 = vsel %vm1175_vm0, %v1921_v32, -inf }
 0x456   : > { %1932 = vmax.xlane.f32.xlu1 %v1931_v56 }
 0x457   : > { %v1928_v57 = vsel %vm1175_vm0, %v1920_v8, -inf }
 0x458   : > { %1929 = vmax.xlane.f32.xlu0 %v1928_v57 }
 0x45a   : > { %v2934_v10 = vpop.f32.mrf.mxu1 }
 0x45b   : > { %v1923_v16 = vmul.f32 0.088388346, %v2934_v10 }
 0x45c   : > { %v1761_v24 = vpop.f32.mrf.mxu1 }
 0x45d   : > { %v1922_v42 = vmul.f32 0.088388346, %v1761_v24  ;;  %v1937_v21 = vsel %vm1175_vm0, %v1923_v16, -inf }
 0x45e   : > { %1938 = vmax.xlane.f32.xlu1 %v1937_v21 }
 0x45f   : > { %v1934_v17 = vsel %vm1175_vm0, %v1922_v42, -inf }
 0x460   : > { %1935 = vmax.xlane.f32.xlu0 %v1934_v17 }
 0x462   : > { %1944 = vmax.xlane.f32.xlu1 %v1943_v40  ;;  %v2948_v45 = vpop.f32.mrf.mxu1 }
 0x463   : > { %v1927_v46 = vmul.f32 0.088388346, %v2948_v45 }
 0x464   : > { %1941 = vmax.xlane.f32.xlu0 %v1940_v47  ;;  %v1911_v49 = vpop.f32.mrf.mxu1 }
 0x465   : > { %v1926_v50 = vmul.f32 0.088388346, %v1911_v49  ;;  %v1949_v51 = vsel %vm1175_vm0, %v1927_v46, -inf }
 0x466   : > { %1950 = vmax.xlane.f32.xlu1 %v1949_v51 }
 0x467   : > { %v1946_v55 = vsel %vm1175_vm0, %v1926_v50, -inf }
 0x468   : > { %1947 = vmax.xlane.f32.xlu0 %v1946_v55 }
 0x4df   : > { %v1933_v58 = vpop.xlane.xlu1 %1932 }
 0x4e0   : > { %v1953_v61 = vsub.f32 %v1921_v32, %v1933_v58 }
 0x4e1   : > { %v1930_v63 = vpop.xlane.xlu0 %1929 }
 0x4e2   : > { %v1962_v6 = vmul.f32 1.442695, %v1953_v61  ;;  %v1952_v11 = vsub.f32 %v1920_v8, %v1930_v63 }
 0x4e4   : > { %3093 = vpow2.f32 %v1962_v6  ;;  %v1960_v14 = vmul.f32 1.442695, %v1952_v11  ;;  %v2371_v6 = vld [vmem:[#allocation8 + $0x1f8] sm:$0xff] }
 0x4e6   : > { %3095 = vpow2.f32 %v1960_v14 }
 0x4e7   : > { %v1939_v19 = vpop.xlane.xlu1 %1938 }
 0x4e8   : > { %v1955_v22 = vsub.f32 %v1923_v16, %v1939_v19 }
 0x4e9   : > { %v1936_v15 = vpop.xlane.xlu0 %1935 }
 0x4ea   : > { %v1966_v27 = vmul.f32 1.442695, %v1955_v22  ;;  %v1954_v26 = vsub.f32 %v1922_v42, %v1936_v15 }
 0x4eb   : > { %v1945_v62 = vpop.xlane.xlu1 %1944 }
 0x4ec   : > { %3097 = vpow2.f32 %v1966_v27  ;;  %v1964_v18 = vmul.f32 1.442695, %v1954_v26  ;;  %v1957_v29 = vsub.f32 %v1925_v39, %v1945_v62 }
 0x4ed   : > { %v1942_v53 = vpop.xlane.xlu0 %1941 }
 0x4ee   : > { %3099 = vpow2.f32 %v1964_v18  ;;  %v1970_v4 = vmul.f32 1.442695, %v1957_v29  ;;  %v1956_v20 = vsub.f32 %v1924_v35, %v1942_v53  ;;  %v2370_v18 = vld [vmem:[#allocation8 + $0x1f0] sm:$0xff] }
 0x4ef   : > { %v1951_v48 = vpop.xlane.xlu1 %1950 }
 0x4f0   : > { %3101 = vpow2.f32 %v1970_v4  ;;  %v1968_v30 = vmul.f32 1.442695, %v1956_v20  ;;  %v1959_v28 = vsub.f32 %v1927_v46, %v1951_v48  ;;  %v2368_v4 = vld [vmem:[#allocation8 + $0x1e0] sm:$0xff]  ;;  %v3313_v48 = vmov 0.0  }
 0x4f1   : > { %v3094_v33 = vpop.eup %3093  ;;  %v1948_v1 = vpop.xlane.xlu0 %1947 }
 0x4f2   : > { %3103 = vpow2.f32 %v1968_v30  ;;  %v1974_v34 = vmul.f32 1.442695, %v1959_v28  ;;  %v1958_v37 = vsub.f32 %v1926_v50, %v1948_v1  ;;  %v1979_v25 = vsel %vm1175_vm0, %v3094_v33, 0.0  ;;  %v1618_v28 = vld [vmem:[#allocation8 + $0xf0] sm:$0xff]  ;;  %v1616_v1 = vld [vmem:[#allocation8 + $0xe0] sm:$0xff] }
 0x4f3   : > { %v3096_v12 = vpop.eup %3095  ;;  %1980 = vadd.xlane.f32.xlu1 %v1979_v25  ;;  %v2364_v25 = vld [vmem:[#allocation8 + $0x1c0] sm:$0xff] }
 0x4f4   : > { %3105 = vpow2.f32 %v1974_v34  ;;  %v1972_v32 = vmul.f32 1.442695, %v1958_v37  ;;  %v1976_v41 = vsel %vm1175_vm0, %v3096_v12, 0.0  ;;  %v2365_v34 = vld [vmem:[#allocation8 + $0x1c8] sm:$0xff]  ;;  %v1615_v37 = vld [vmem:[#allocation8 + $0xd8] sm:$0xff] }
 0x4f5   : > { %1977 = vadd.xlane.f32.xlu0 %v1976_v41  ;;  %v1613_v41 = vld [vmem:[#allocation8 + $0xc8] sm:$0xff] }
 0x4f6   : > { %3107 = vpow2.f32 %v1972_v32  ;;  %v2363_v32 = vld [vmem:[#allocation8 + $0x1b8] sm:$0xff] }
 0x4f9   : > { %v3098_v8 = vpop.eup %3097 }
 0x4fa   : > { %v1985_v56 = vsel %vm1175_vm0, %v3098_v8, 0.0 }
 0x4fb   : > { %v3100_v57 = vpop.eup %3099  ;;  %1986 = vadd.xlane.f32.xlu1 %v1985_v56  ;;  %v1612_v56 = vld [vmem:[#allocation8 + $0xc0] sm:$0xff] }
 0x4fc   : > { %v1982_v2 = vsel %vm1175_vm0, %v3100_v57, 0.0 }
 0x4fd   : > { %v3102_v10 = vpop.eup %3101  ;;  %1983 = vadd.xlane.f32.xlu0 %v1982_v2  ;;  %v1611_v2 = vld [vmem:[#allocation8 + $0xb8] sm:$0xff] }
 0x4fe   : > { %v1991_v16 = vsel %vm1175_vm0, %v3102_v10, 0.0 }
 0x4ff   : > { %v3104_v31 = vpop.eup %3103  ;;  %1992 = vadd.xlane.f32.xlu1 %v1991_v16  ;;  %v1610_v16 = vld [vmem:[#allocation8 + $0xb0] sm:$0xff] }
 0x500   : > { %v1988_v24 = vsel %vm1175_vm0, %v3104_v31, 0.0 }
 0x501   : > { %v3106_v39 = vpop.eup %3105  ;;  %1989 = vadd.xlane.f32.xlu0 %v1988_v24  ;;  %v1609_v24 = vld [vmem:[#allocation8 + $0xa8] sm:$0xff] }
 0x502   : > { %v1997_v42 = vsel %vm1175_vm0, %v3106_v39, 0.0 }
 0x503   : > { %v3108_v21 = vpop.eup %3107  ;;  %1998 = vadd.xlane.f32.xlu1 %v1997_v42  ;;  %v1608_v42 = vld [vmem:[#allocation8 + $0xa0] sm:$0xff] }
 0x504   : > { %v1994_v35 = vsel %vm1175_vm0, %v3108_v21, 0.0 }
 0x505   : > { %1995 = vadd.xlane.f32.xlu0 %v1994_v35  ;;  %v1607_v35 = vld [vmem:[#allocation8 + $0x98] sm:$0xff] }
 0x57c   : > { %v1981_v17 = vpop.xlane.xlu1 %1980 }
 0x57d   : > { %3109 = vrcp.f32 %v1981_v17  ;;  %v2356_v17 = vld [vmem:[#allocation8 + $0x180] sm:$0xff] }
 0x57e   : > { %v1978_v40 = vpop.xlane.xlu0 %1977 }
 0x57f   : > { %3111 = vrcp.f32 %v1978_v40  ;;  %v1606_v40 = vld [vmem:[#allocation8 + $0x90] sm:$0xff] }
 0x584   : > { %v1987_v45 = vpop.xlane.xlu1 %1986 }
 0x585   : > { %3113 = vrcp.f32 %v1987_v45  ;;  %v2355_v45 = vld [vmem:[#allocation8 + $0x178] sm:$0xff] }
 0x586   : > { %v1984_v46 = vpop.xlane.xlu0 %1983 }
 0x587   : > { %3115 = vrcp.f32 %v1984_v46  ;;  %v1605_v46 = vld [vmem:[#allocation8 + $0x88] sm:$0xff] }
 0x588   : > { %v1993_v47 = vpop.xlane.xlu1 %1992 }
 0x589   : > { %3117 = vrcp.f32 %v1993_v47  ;;  %v2354_v47 = vld [vmem:[#allocation8 + $0x170] sm:$0xff] }
 0x58a   : > { %v1990_v49 = vpop.xlane.xlu0 %1989  ;;  %v3110_v50 = vpop.eup %3109 }
 0x58b   : > { %3119 = vrcp.f32 %v1990_v49  ;;  %v2003_v63 = vmul.f32 %v3110_v50, %v3094_v33  ;;  %v2366_v33 = vld [vmem:[#allocation8 + $0x1d0] sm:$0xff]  ;;  %v1604_v49 = vld [vmem:[#allocation8 + $0x80] sm:$0xff]  ;;  %v2353_v50 = vld [vmem:[#allocation8 + $0x168] sm:$0xff] }
 0x58c   : > { %v3112_v51 = vpop.eup %3111  ;;  %v1999_v55 = vpop.xlane.xlu1 %1998 }
 0x58d   : > { %v2001_v58 = vmul.f32 %v3112_v51, %v3096_v12  ;;  %3121 = vrcp.f32 %v1999_v55  ;;  %v1614_v12 = vld [vmem:[#allocation8 + $0xd0] sm:$0xff]  ;;  %v1603_v51 = vld [vmem:[#allocation8 + $0x78] sm:$0xff]  ;;  %v2352_v55 = vld [vmem:[#allocation8 + $0x160] sm:$0xff] }
 0x58e   : > { %v1996_v61 = vpop.xlane.xlu0 %1995 }
 0x58f   : > { %3123 = vrcp.f32 %v1996_v61  ;;  %2953 = vmatprep.mubr.msk.f32.mxu0 %vm1175_vm0, %v2001_v58  ;;  %v1602_v58 = vld [vmem:[#allocation8 + $0x70] sm:$0xff]  ;;  %v2351_v61 = vld [vmem:[#allocation8 + $0x158] sm:$0xff] }
 0x590   : > { %2954 = vmatmul.mubr.msk.f32.vlgmr.msra.gmra.mxu0 %vm1175_vm0, %v2003_v63  ;;  %v1601_v63 = vld [vmem:[#allocation8 + $0x68] sm:$0xff] }
 0x591   : > { %2964 = vmatpush3.msra.mxu0 %v3718_v3  ;;  %v1619_v3 = vld [vmem:[#allocation8 + $0xf8] sm:$0xff] }
 0x592   : > { %2965 = vmatprep.subr.mxu0 %v3710_v60  ;;  %v3114_v11 = vpop.eup %3113 }
 0x593   : > { %2966 = vmatpush3.msra.mxu0 %v3710_v60  ;;  %v2007_v22 = vmul.f32 %v3114_v11, %v3098_v8  ;;  %v2369_v60 = vld [vmem:[#allocation8 + $0x1e8] sm:$0xff]  ;;  %v2362_v8 = vld [vmem:[#allocation8 + $0x1b0] sm:$0xff]  ;;  %v1600_v11 = vld [vmem:[#allocation8 + $0x60] sm:$0xff] }
 0x594   : > { %v3116_v14 = vpop.eup %3115  ;;  %2372 = vmatprep.subr.mxu0 %v2371_v6  ;;  %v2350_v6 = vld [vmem:[#allocation8 + $0x150] sm:$0xff] }
 0x595   : > { %v2005_v19 = vmul.f32 %v3116_v14, %v3100_v57  ;;  %v2361_v57 = vld [vmem:[#allocation8 + $0x1a8] sm:$0xff] }
 0x596   : > { %v3118_v15 = vpop.eup %3117  ;;  %v2349_v14 = vld [vmem:[#allocation8 + $0x148] sm:$0xff] }
 0x597   : > { %2960 = vmatprep.mubr.msk.f32.mxu1 %vm1175_vm0, %v2005_v19  ;;  %v2011_v62 = vmul.f32 %v3118_v15, %v3102_v10  ;;  %v2360_v10 = vld [vmem:[#allocation8 + $0x1a0] sm:$0xff]  ;;  %v1599_v19 = vld [vmem:[#allocation8 + $0x58] sm:$0xff]  ;;  %v1598_v15 = vld [vmem:[#allocation8 + $0x50] sm:$0xff] }
 0x598   : > { %v3120_v27 = vpop.eup %3119  ;;  %2961 = vmatmul.mubr.msk.f32.vlgmr.msra.gmra.mxu1 %vm1175_vm0, %v2007_v22  ;;  %v2348_v22 = vld [vmem:[#allocation8 + $0x140] sm:$0xff] }
 0x599   : > { %2971 = vmatpush3.msra.mxu1 %v3781_v13  ;;  %v2009_v26 = vmul.f32 %v3120_v27, %v3104_v31  ;;  %v2367_v13 = vld [vmem:[#allocation8 + $0x1d8] sm:$0xff] }
 0x59a   : > { %2972 = vmatprep.subr.mxu1 %v3722_v7  ;;  %v3122_v29 = vpop.eup %3121  ;;  %v2359_v31 = vld [vmem:[#allocation8 + $0x198] sm:$0xff] }
 0x59b   : > { %2973 = vmatpush3.msra.mxu1 %v3722_v7  ;;  %2967 = vmatprep.mubr.msk.f32.mxu0 %vm1175_vm0, %v2009_v26  ;;  %v2015_v30 = vmul.f32 %v3122_v29, %v3106_v39  ;;  %v1617_v7 = vld [vmem:[#allocation8 + $0xe8] sm:$0xff]  ;;  %v2358_v39 = vld [vmem:[#allocation8 + $0x190] sm:$0xff]  ;;  %v2347_v27 = vld [vmem:[#allocation8 + $0x138] sm:$0xff] }
 0x59c   : > { %v3124_v53 = vpop.eup %3123  ;;  %2968 = vmatmul.mubr.msk.f32.vlgmr.msra.gmra.mxu0 %vm1175_vm0, %v2011_v62  ;;  %2485 = vmatprep.subr.mxu1 %v1619_v3  ;;  %v1597_v26 = vld [vmem:[#allocation8 + $0x48] sm:$0xff]  ;;  %v2346_v3 = vld [vmem:[#allocation8 + $0x130] sm:$0xff]  ;;  %v1596_v62 = vld [vmem:[#allocation8 + $0x40] sm:$0xff] }
 0x59d   : > { %v2013_v20 = vmul.f32 %v3124_v53, %v3108_v21  ;;  %2373 = vmatpush1.msra.mxu0 %v2370_v18  ;;  %2436 = vmatprep.mubr.f32.mxu0 %v3313_v48  ;;  %v2357_v21 = vld [vmem:[#allocation8 + $0x188] sm:$0xff]  ;;  %v1595_v29 = vld [vmem:[#allocation8 + $0x38] sm:$0xff]  ;;  %v1594_v53 = vld [vmem:[#allocation8 + $0x30] sm:$0xff] }
 0x59e   : > { %2374 = vmatprep.subr.mxu0 %v2369_v60  ;;  %v2345_v18 = vld [vmem:[#allocation8 + $0x128] sm:$0xff]  ;;  %v2344_v60 = vld [vmem:[#allocation8 + $0x120] sm:$0xff] }
 0x59f   : > { %2974 = vmatprep.mubr.msk.f32.mxu1 %vm1175_vm0, %v2013_v20  ;;  %2375 = vmatpush1.msra.mxu0 %v2368_v4  ;;  %v2343_v4 = vld [vmem:[#allocation8 + $0x118] sm:$0xff]  ;;  %v1593_v20 = vld [vmem:[#allocation8 + $0x28] sm:$0xff] }
 0x5a0   : > { %2975 = vmatmul.mubr.msk.f32.vlgmr.msra.gmra.mxu1 %vm1175_vm0, %v2015_v30  ;;  %2376 = vmatprep.subr.mxu0 %v2367_v13  ;;  %v1592_v13 = vld [vmem:[#allocation8 + $0x20] sm:$0xff]  ;;  %v1591_v30 = vld [vmem:[#allocation8 + $0x18] sm:$0xff] }
 0x5a1   : > { %2486 = vmatpush1.msra.mxu1 %v1618_v28  ;;  %2549 = vmatprep.mubr.f32.mxu1 %v3313_v48  ;;  %v1590_v28 = vld [vmem:[#allocation8 + $0x10] sm:$0xff] }
 0x5a2   : > { %2487 = vmatprep.subr.mxu1 %v1617_v7  ;;  %2377 = vmatpush1.msra.mxu0 %v2366_v33  ;;  %v1589_v7 = vld [vmem:[#allocation8 + $0x8] sm:$0xff]  ;;  %v1588_v33 = vld [vmem:[#allocation8] sm:$0xff] }
 0x5a3   : > { %2488 = vmatpush1.msra.mxu1 %v1616_v1  ;;  %2378 = vmatprep.subr.mxu0 %v2365_v34  ;;  %v2342_v1 = vld [vmem:[#allocation8 + $0x110] sm:$0xff]  ;;  %v2341_v34 = vld [vmem:[#allocation8 + $0x108] sm:$0xff] }
 0x5a4   : > { %2489 = vmatprep.subr.mxu1 %v1615_v37  ;;  %2379 = vmatpush1.msra.mxu0 %v2364_v25 }
 0x5a5   : > { %2490 = vmatpush1.msra.mxu1 %v1614_v12  ;;  %2380 = vmatprep.subr.mxu0 %v2363_v32 }
 0x5a6   : > { %2491 = vmatprep.subr.mxu1 %v1613_v41  ;;  %2381 = vmatpush1.msra.mxu0 %v2362_v8 }
 0x5a7   : > { %2492 = vmatpush1.msra.mxu1 %v1612_v56  ;;  %2382 = vmatprep.subr.mxu0 %v2361_v57 }
 0x5a8   : > { %2493 = vmatprep.subr.mxu1 %v1611_v2  ;;  %2383 = vmatpush1.msra.mxu0 %v2360_v10  ;;  %v2598_v2 = vld [vmem:[%s3957_s4] sm:$0x3] }
 0x5a9   : > { %2494 = vmatpush1.msra.mxu1 %v1610_v16  ;;  %2384 = vmatprep.subr.mxu0 %v2359_v31  ;;  %v3861_v16 = vrot.slane %v2598_v2, %v500_v5 }
 0x5aa   : > { %2495 = vmatprep.subr.mxu1 %v1609_v24  ;;  %2385 = vmatpush1.msra.mxu0 %v2358_v39  ;;  %v3865_v24 = vrot.slane %v2598_v2, %v504_v9 }
 0x5ab   : > { %2496 = vmatpush1.msra.mxu1 %v1608_v42  ;;  %2386 = vmatprep.subr.mxu0 %v2357_v21 }
 0x5ac   : > { %2497 = vmatprep.subr.mxu1 %v1607_v35  ;;  %2387 = vmatpush1.msra.mxu0 %v2356_v17 }
 0x5ad   : > { %2498 = vmatpush1.msra.mxu1 %v1606_v40  ;;  %2388 = vmatprep.subr.mxu0 %v2355_v45 }
 0x5ae   : > { %2499 = vmatprep.subr.mxu1 %v1605_v46  ;;  %2389 = vmatpush1.msra.mxu0 %v2354_v47 }
 0x5af   : > { %2500 = vmatpush1.msra.mxu1 %v1604_v49  ;;  %2390 = vmatprep.subr.mxu0 %v2353_v50 }
 0x5b0   : > { %2501 = vmatprep.subr.mxu1 %v1603_v51  ;;  %2391 = vmatpush1.msra.mxu0 %v2352_v55 }
 0x5b1   : > { %2502 = vmatpush1.msra.mxu1 %v1602_v58  ;;  %2392 = vmatprep.subr.mxu0 %v2351_v61 }
 0x5b2   : > { %2503 = vmatprep.subr.mxu1 %v1601_v63  ;;  %2393 = vmatpush1.msra.mxu0 %v2350_v6 }
 0x5b3   : > { %2504 = vmatpush1.msra.mxu1 %v1600_v11  ;;  %2394 = vmatprep.subr.mxu0 %v2349_v14 }
 0x5b4   : > { %2505 = vmatprep.subr.mxu1 %v1599_v19  ;;  %2395 = vmatpush1.msra.mxu0 %v2348_v22 }
 0x5b5   : > { %2506 = vmatpush1.msra.mxu1 %v1598_v15  ;;  %2396 = vmatprep.subr.mxu0 %v2347_v27 }
 0x5b6   : > { %2507 = vmatprep.subr.mxu1 %v1597_v26  ;;  %2397 = vmatpush1.msra.mxu0 %v2346_v3 }
 0x5b7   : > { %2508 = vmatpush1.msra.mxu1 %v1596_v62  ;;  %2398 = vmatprep.subr.mxu0 %v2345_v18 }
 0x5b8   : > { %2509 = vmatprep.subr.mxu1 %v1595_v29  ;;  %2399 = vmatpush1.msra.mxu0 %v2344_v60 }
 0x5b9   : > { %2510 = vmatpush1.msra.mxu1 %v1594_v53  ;;  %2400 = vmatprep.subr.mxu0 %v2343_v4 }
 0x5ba   : > { %2511 = vmatprep.subr.mxu1 %v1593_v20  ;;  %2401 = vmatpush1.msra.mxu0 %v2342_v1 }
 0x5bb   : > { %2512 = vmatpush1.msra.mxu1 %v1592_v13  ;;  %2402 = vmatprep.subr.mxu0 %v2341_v34 }
 0x5bc   : > { %2513 = vmatprep.subr.mxu1 %v1591_v30 }
 0x5bd   : > { %2514 = vmatpush1.msra.mxu1 %v1590_v28 }
 0x5be   : > { %2515 = vmatprep.subr.mxu1 %v1589_v7 }
 0x5bf   : > { %2516 = vmatpush1.msra.mxu1 %v1588_v33 }
 0x5c0   : > { %2550 = vmatmul.mubr.f32.vlgmr.msra.gmra.mxu1 %v3788_v38  ;;  %v2340_v38 = vld [vmem:[#allocation8 + $0x100] sm:$0xff] }
 0x5c1   : > { %2555 = vmatprep.mubr.f32.mxu1 %v3313_v48  ;;  %2403 = vmatpush1.msra.mxu0 %v2340_v38 }
 0x5c4   : > { %2556 = vmatmul.mubr.f32.gmra.mxu1 %v3786_v36 }
 0x5c5   : > { %2561 = vmatprep.mubr.f32.mxu1 %v3313_v48 }
 0x5c8   : > { %2562 = vmatmul.mubr.f32.gmra.mxu1 %v3792_v44 }
 0x5c9   : > { %2567 = vmatprep.mubr.f32.mxu1 %v3313_v48 }
 0x5cc   : > { %2568 = vmatmul.mubr.f32.gmra.mxu1 %v3790_v43 }
 0x5cd   : > { %2573 = vmatprep.mubr.f32.mxu1 %v3313_v48 }
 0x5d0   : > { %2574 = vmatmul.mubr.f32.gmra.mxu1 %v3796_v54 }
 0x5d1   : > { %2579 = vmatprep.mubr.f32.mxu1 %v3313_v48 }
 0x5d4   : > { %2580 = vmatmul.mubr.f32.gmra.mxu1 %v3794_v52 }
 0x5d5   : > { %2585 = vmatprep.mubr.f32.mxu1 %v3313_v48 }
 0x5d8   : > { %2586 = vmatmul.mubr.f32.gmra.mxu1 %v3800_v23 }
 0x5d9   : > { %2591 = vmatprep.mubr.f32.mxu1 %v3313_v48 }
 0x5dc   : > { %2592 = vmatmul.mubr.f32.gmra.mxu1 %v3798_v59 }
 0x650   : > { %v2955_v36 = vpop.f32.mrf.mxu0 }
 0x652   : > { %v2088_v43 = vpop.f32.mrf.mxu0 }
 0x653   : > { %2437 = vmatmul.mubr.f32.vlgmr.msra.gmra.mxu0 %v2088_v43 }
 0x654   : > { %2442 = vmatprep.mubr.f32.mxu0 %v3313_v48 }
 0x657   : > { %2443 = vmatmul.mubr.f32.gmra.mxu0 %v2955_v36 }
 0x658   : > { %v2962_v44 = vpop.f32.mrf.mxu1  ;;  %2448 = vmatprep.mubr.f32.mxu0 %v3313_v48 }
 0x65a   : > { %v2169_v54 = vpop.f32.mrf.mxu1 }
 0x65b   : > { %2449 = vmatmul.mubr.f32.gmra.mxu0 %v2169_v54 }
 0x65c   : > { %2454 = vmatprep.mubr.f32.mxu0 %v3313_v48  ;;  %v2969_v52 = vpop.f32.mrf.mxu0 }
 0x65e   : > { %v2250_v23 = vpop.f32.mrf.mxu0 }
 0x65f   : > { %2455 = vmatmul.mubr.f32.gmra.mxu0 %v2962_v44 }
 0x660   : > { %2460 = vmatprep.mubr.f32.mxu0 %v3313_v48  ;;  %v2976_v59 = vpop.f32.mrf.mxu1 }
 0x662   : > { %v2331_v37 = vpop.f32.mrf.mxu1 }
 0x663   : > { %2461 = vmatmul.mubr.f32.gmra.mxu0 %v2250_v23 }
 0x664   : > { %2466 = vmatprep.mubr.f32.mxu0 %v3313_v48 }
 0x667   : > { %2467 = vmatmul.mubr.f32.gmra.mxu0 %v2969_v52 }
 0x668   : > { %2472 = vmatprep.mubr.f32.mxu0 %v3313_v48 }
 0x66b   : > { %2473 = vmatmul.mubr.f32.gmra.mxu0 %v2331_v37 }
 0x66c   : > { %2478 = vmatprep.mubr.f32.mxu0 %v3313_v48 }
 0x66f   : > { %2479 = vmatmul.mubr.f32.gmra.mxu0 %v2976_v59 }
 0x680   : > { %v2551_v25 = vpop.f32.mrf.mxu1 }
 0x682   : > { %v2553_v12 = vpop.f32.mrf.mxu1 }
 0x684   : > { %v2557_v32 = vpop.f32.mrf.mxu1 }
 0x686   : > { %v2559_v41 = vpop.f32.mrf.mxu1 }
 0x688   : > { %v2563_v8 = vpop.f32.mrf.mxu1 }
 0x68a   : > { %v2565_v56 = vpop.f32.mrf.mxu1 }
 0x68c   : > { %v2569_v57 = vpop.f32.mrf.mxu1 }
 0x68e   : > { %v2571_v10 = vpop.f32.mrf.mxu1 }
 0x690   : > { %v2575_v39 = vpop.f32.mrf.mxu1 }
 0x692   : > { %v2577_v0 = vpop.f32.mrf.mxu1 }
 0x694   : > { %v2581_v51 = vpop.f32.mrf.mxu1 }
 0x696   : > { %v2583_v14 = vpop.f32.mrf.mxu1 }
 0x698   : > { %v2587_v62 = vpop.f32.mrf.mxu1 }
 0x69a   : > { %v2589_v13 = vpop.f32.mrf.mxu1 }
 0x69c   : > { %v2593_v38 = vpop.f32.mrf.mxu1 }
 0x69e   : > { %v2595_v59 = vpop.f32.mrf.mxu1 }
 0x713   : > { %v2438_v31 = vpop.f32.mrf.mxu0 }
 0x714   : > { %v2552_v48 = vadd.f32 %v2551_v25, %v2438_v31 }
 0x715   : > { %v2440_v42 = vpop.f32.mrf.mxu0 }
 0x716   : > { %v2610_v21 = vadd.f32 %v3861_v16, %v2552_v48  ;;  %v2554_v35 = vadd.f32 %v2553_v12, %v2440_v42 }
 0x717   : > { %v2444_v17 = vpop.f32.mrf.mxu0 }
 0x718   : > { %2626 = vst [vmem:[%s3870_s27] sm:$0xff] %v2610_v21  ;;  %v2611_v5 = vadd.f32 %v3865_v24, %v2554_v35  ;;  %v2558_v40 = vadd.f32 %v2557_v32, %v2444_v17 }
 0x719   : > { %v2446_v9 = vpop.f32.mrf.mxu0 }
 0x71a   : > { %2627 = vst [vmem:[%s3870_s27 + $0x8] sm:$0xff] %v2611_v5  ;;  %v2612_v45 = vadd.f32 %v3861_v16, %v2558_v40  ;;  %v2560_v46 = vadd.f32 %v2559_v41, %v2446_v9 }
 0x71b   : > { %v2450_v47 = vpop.f32.mrf.mxu0 }
 0x71c   : > { %2628 = vst [vmem:[%s3870_s27 + $0x10] sm:$0xff] %v2612_v45  ;;  %v2613_v49 = vadd.f32 %v3865_v24, %v2560_v46  ;;  %v2564_v50 = vadd.f32 %v2563_v8, %v2450_v47 }
 0x71d   : > { %v2452_v55 = vpop.f32.mrf.mxu0 }
 0x71e   : > { %2629 = vst [vmem:[%s3870_s27 + $0x18] sm:$0xff] %v2613_v49  ;;  %v2614_v58 = vadd.f32 %v3861_v16, %v2564_v50  ;;  %v2566_v61 = vadd.f32 %v2565_v56, %v2452_v55 }
 0x71f   : > { %v2456_v63 = vpop.f32.mrf.mxu0 }
 0x720   : > { %2630 = vst [vmem:[%s3870_s27 + $0x20] sm:$0xff] %v2614_v58  ;;  %v2615_v6 = vadd.f32 %v3865_v24, %v2566_v61  ;;  %v2570_v11 = vadd.f32 %v2569_v57, %v2456_v63 }
 0x721   : > { %v2458_v19 = vpop.f32.mrf.mxu0 }
 0x722   : > { %2631 = vst [vmem:[%s3870_s27 + $0x28] sm:$0xff] %v2615_v6  ;;  %v2616_v22 = vadd.f32 %v3861_v16, %v2570_v11  ;;  %v2572_v15 = vadd.f32 %v2571_v10, %v2458_v19 }
 0x723   : > { %v2462_v27 = vpop.f32.mrf.mxu0 }
 0x724   : > { %2632 = vst [vmem:[%s3870_s27 + $0x30] sm:$0xff] %v2616_v22  ;;  %v2617_v26 = vadd.f32 %v3865_v24, %v2572_v15  ;;  %v2576_v3 = vadd.f32 %v2575_v39, %v2462_v27 }
 0x725   : > { %v2464_v18 = vpop.f32.mrf.mxu0 }
 0x726   : > { %2633 = vst [vmem:[%s3870_s27 + $0x38] sm:$0xff] %v2617_v26  ;;  %v2618_v29 = vadd.f32 %v3861_v16, %v2576_v3  ;;  %v2578_v60 = vadd.f32 %v2577_v0, %v2464_v18 }
 0x727   : > { %v2468_v53 = vpop.f32.mrf.mxu0 }
 0x728   : > { %2634 = vst [vmem:[%s3870_s27 + $0x40] sm:$0xff] %v2618_v29  ;;  %v2619_v4 = vadd.f32 %v3865_v24, %v2578_v60  ;;  %v2582_v20 = vadd.f32 %v2581_v51, %v2468_v53 }
 0x729   : > { %v2470_v30 = vpop.f32.mrf.mxu0 }
 0x72a   : > { %2635 = vst [vmem:[%s3870_s27 + $0x48] sm:$0xff] %v2619_v4  ;;  %v2620_v28 = vadd.f32 %v3861_v16, %v2582_v20  ;;  %v2584_v7 = vadd.f32 %v2583_v14, %v2470_v30 }
 0x72b   : > { %v2474_v33 = vpop.f32.mrf.mxu0 }
 0x72c   : > { %2636 = vst [vmem:[%s3870_s27 + $0x50] sm:$0xff] %v2620_v28  ;;  %v2621_v1 = vadd.f32 %v3865_v24, %v2584_v7  ;;  %v2588_v34 = vadd.f32 %v2587_v62, %v2474_v33 }
 0x72d   : > { %v2476_v36 = vpop.f32.mrf.mxu0 }
 0x72e   : > { %2637 = vst [vmem:[%s3870_s27 + $0x58] sm:$0xff] %v2621_v1  ;;  %v2622_v43 = vadd.f32 %v3861_v16, %v2588_v34  ;;  %v2590_v44 = vadd.f32 %v2589_v13, %v2476_v36 }
 0x72f   : > { %v2480_v54 = vpop.f32.mrf.mxu0 }
 0x730   : > { %2638 = vst [vmem:[%s3870_s27 + $0x60] sm:$0xff] %v2622_v43  ;;  %v2623_v52 = vadd.f32 %v3865_v24, %v2590_v44  ;;  %v2594_v23 = vadd.f32 %v2593_v38, %v2480_v54 }
 0x731   : > { %v2482_v37 = vpop.f32.mrf.mxu0 }
 0x732   : > { %2639 = vst [vmem:[%s3870_s27 + $0x68] sm:$0xff] %v2623_v52  ;;  %v2624_v25 = vadd.f32 %v3861_v16, %v2594_v23  ;;  %v2596_v12 = vadd.f32 %v2595_v59, %v2482_v37 }
 0x734   : > { %2640 = vst [vmem:[%s3870_s27 + $0x70] sm:$0xff] %v2624_v25  ;;  %v2625_v32 = vadd.f32 %v3865_v24, %v2596_v12 }
 0x736   : > { %2641 = vst [vmem:[%s3870_s27 + $0x78] sm:$0xff] %v2625_v32 }
 0x737   : > { %3244 = shalt.err (!%p3241_p9)
}
 0x738   : > { %s3245_s23 = scalar_lea.hbm %s3905_s14, 2048  ;;  %s3249_s24 = scalar_lea.hbm %s3958_s5, 4096 }
 0x739   : > { %p3246_p1 = scmp.ne.s32.totalorder %s3905_s14, %s3245_s23  ;;  %p3250_p11 = scmp.lt.s32.totalorder %s3905_s14, %s3958_s5 }
 0x73a   : > { %p3251_p13 = scmp.lt.s32.totalorder %s3249_s24, %s3245_s23 }
 0x73b   : > { %p3247_p8 = pnand %p3246_p1, %p3978_p6 }
 0x73c   : > { %p3252_p2 = por %p3251_p13, %p3250_p11 }
 0x73d   : > { %p3248_p10 = pneg %p3247_p8 }
 0x73f   : > { %p3253_p4 = pnand %p3252_p2, %p3248_p10 }
 0x741   : > { %3256 = shalt.err (!%p3253_p4)
}
 0x742   : > { %s3315_s15 = smov 256   ;;  %s3316_s30 = smov 16  }
 0x743   : > { %2991 = dma.vmem_to_hbm [thread:$0]  (%p3978_p6), %s3907_s17, 2048, %s3905_s14, %s2643_s22, %s3315_s15, %s3315_s15, %s3316_s30  }
 0x744 PF: > { %s2672_s13 = sand.u32 1, %s3291_s18   ;;  %p3979_p12 = scmp.ne.s32.totalorder %s3965_s25, 0 }
 0x745   : > { %p3980_p0 = scmp.ge.s32.totalorder %s3303_s21, 2  ;;  %s2673_s11 = scalar_lea.sflag [#allocation4], %s2672_s13 }
 0x747   : > { %p3008_p5 = pnand %p3980_p0, %p3979_p12 }
 0x749   : > { %p3009_p3 = pneg %p3008_p5 }
 0x74b   : > { %3286 = dma.done.wait (%p3009_p3), %s2673_s11, 2048  }
 0x74c   : > { %3288 = vsyncadd (%p3009_p3), %s2673_s11, 4294965248  ;;  %p20_p7 = scmp.ge.s32.totalorder %s3430_s6, 4   ;;  %s3981_s18 = smov %s3295_s19 }
 0x74d   : > { %s3982_s19 = smov %s3299_s20  ;;  %s3983_s20 = smov %s3440_s10 }
 0x74e   : > { %s3984_s21 = smov %s3430_s6  ;;  %22 = sbr.rel (!%p20_p7) target bundleno = 7 (0x7), region = 97 }
 0x753   :  { %2678 = vsyncpa [#allocation3], 1 }
 0x754   :  { %2680 = vsyncpa [#allocation3 + $0x1], 1 }
 0x755   :  { %2681 = vsyncpa [#allocation6], 1 }
 0x756   :  { %2682 = vsyncpa [#allocation9], 1 }
 0x757   :  { %2683 = vsyncpa [#allocation4], 1 }
 0x758   :  { %2685 = vsyncpa [#allocation4 + $0x1], 1 }

</bundles_post_ra>
